<compile_context>
chip_gen: v7x
topology: tpu7x:2x2x1
jax: 0.10.0
libtpu: 0.0.40
codegen_flags: <defaults>
</compile_context>

<pallas_src>
import functools
import math

import jax
import jax.numpy as jnp
from jax.experimental import pallas as pl
from jax.experimental.pallas import tpu as pltpu


_VMEM = pl.BlockSpec(memory_space=pltpu.MemorySpace.VMEM)


# ----------------------------------------------------------------------------
# Fused whole-model kernel (3 x GraphConvolution + outer ReLUs)
# ----------------------------------------------------------------------------
def _gcn_hete_kernel(adj_ref, x_ref, *refs, num_layers, order, pad_f, active):
    P = pad_f
    param_refs = refs[:6 * num_layers]
    out_refs = refs[6 * num_layers:]

    adj = adj_ref[...]                                           # bf16 [N, N]
    x = x_ref[...]                                               # bf16 [N, in_pad]

    for l in range(num_layers):                                  # static unroll
        (wcat_ref, bcat_ref, fc1_wT_ref, fc1_b_ref,
         fc2_wT_ref, fc2_b_ref) = param_refs[6 * l: 6 * l + 6]

        # ---- one wide MXU matmul for all branches: X @ [W1 | W2 | W3] ------
        h = jnp.dot(x, wcat_ref[...],
                    preferred_element_type=jnp.float32)          # f32 [N, order*P]
        if active:
            h = jnp.tanh(h)

        # ---- chained adjacency hops on a shrinking, 128-lane-aligned concat
        # After hop k+1 the leading P lanes are the finished order-(k+1) branch.
        bcat = bcat_ref[...]                                     # f32 [order, P]
        branches = []
        cur = h
        for k in range(order):
            cur = jnp.dot(adj, cur.astype(jnp.bfloat16),
                          preferred_element_type=jnp.float32)    # [N, (order-k)*P]
            branches.append(cur[:, :P] + bcat[k:k + 1, :])       # lane-aligned slice
            if k + 1 < order:
                cur = cur[:, P:]                                 # lane-aligned slice

        # ---- attention: softmax_k( fc2(relu(fc1(mean_rows(H_k)))) ), batched
        mcat = jnp.concatenate(
            [jnp.mean(b, axis=0, keepdims=True) for b in branches],
            axis=0)                                              # [order, P]
        t = jnp.dot(mcat, fc1_wT_ref[...],
                    preferred_element_type=jnp.float32) + fc1_b_ref[...]
        t = jnp.maximum(t, 0.0)
        logits = jnp.dot(t, fc2_wT_ref[...],
                         preferred_element_type=jnp.float32) + fc2_b_ref[...]
        mx = jnp.max(logits, axis=0, keepdims=True)
        e = jnp.exp(logits - mx)
        a = e * pl.reciprocal(jnp.sum(e, axis=0, keepdims=True), approx=False)

        # ---- weighted combine + outer torch.relu of GCN_hete ----------------
        out = branches[0] * a[0:1, :]
        for k in range(1, order):
            out = out + branches[k] * a[k:k + 1, :]
        out = jnp.maximum(out, 0.0)

        out_refs[l][...] = out.astype(out_refs[l].dtype)         # lane-dense store
        x = out.astype(jnp.bfloat16)                             # next layer input, stays in VMEM


# ----------------------------------------------------------------------------
# Parameter packing (lane-padded, pre-transposed, bf16 MXU operands)
# ----------------------------------------------------------------------------
def _pad2d(a, rows, cols, dtype=None):
    dtype = a.dtype if dtype is None else dtype
    out = jnp.zeros((rows, cols), dtype)
    return out.at[:a.shape[0], :a.shape[1]].set(a.astype(dtype))


def _pack_layer(p, in_pad, pad_f):
    order = len(p["w"])
    out_f = p["w"][0].shape[1]
    hid = p["fc1_w"].shape[0]
    wcat = jnp.concatenate([_pad2d(w, in_pad, pad_f) for w in p["w"]],
                           axis=1).astype(jnp.bfloat16)          # [in_pad, order*P]
    bcat = jnp.zeros((order, pad_f), jnp.float32)
    for k, b in enumerate(p["b"]):
        bcat = bcat.at[k, :out_f].set(b)
    fc1_wT = _pad2d(p["fc1_w"].T, pad_f, hid, jnp.float32)       # [P, hid]
    fc1_b = p["fc1_b"].reshape(1, hid).astype(jnp.float32)
    fc2_wT = _pad2d(p["fc2_w"].T, hid, pad_f, jnp.float32)       # [hid, P]
    fc2_b = _pad2d(p["fc2_b"].reshape(1, out_f), 1, pad_f, jnp.float32)
    return [wcat, bcat, fc1_wT, fc1_b, fc2_wT, fc2_b]


# ----------------------------------------------------------------------------
# Wrapper: whole GCN_hete forward in a single pallas_call
# ----------------------------------------------------------------------------
def gcn_hete_forward(adj, features, p_hete, p_hete2, p_hete3, *, active=True):
    layer_params = (p_hete, p_hete2, p_hete3)
    num_layers = len(layer_params)
    n, in_f = features.shape
    order = len(p_hete["w"])
    out_f = p_hete["w"][0].shape[1]

    LANE = 128
    pad_f = pl.cdiv(out_f, LANE) * LANE          # per-branch lane-aligned width
    in_pad = pl.cdiv(in_f, LANE) * LANE

    adj_b = adj.astype(jnp.bfloat16)                             # cast once for all layers
    x = _pad2d(features, n, in_pad, jnp.bfloat16)                # [N, in_pad]

    packed = []
    cur_in = in_pad
    for p in layer_params:
        packed += _pack_layer(p, cur_in, pad_f)
        cur_in = pad_f                           # layers 2/3 consume padded activations

    # ---- VMEM budget: actual resident set + headroom, clamped for v7x -------
    param_bytes = sum(int(a.size) * a.dtype.itemsize for a in packed)
    resident = (2 * n * n + 2 * n * in_pad + param_bytes
                + 4 * n * pad_f * (4 * order + 2) * num_layers   # f32 intermediates (rough)
                + 4 * n * pad_f * num_layers)                    # outputs
    vmem_limit = int(min(64 * 2 ** 20, max(32 * 2 ** 20, 2 * resident)))

    flops = num_layers * (2 * n * in_pad * order * pad_f                # X @ Wcat
                          + 2 * n * n * pad_f * (order * (order + 1) // 2)  # hops
                          + 4 * n * order * pad_f)                      # combine
    transcendentals = num_layers * (n * order * pad_f + order * pad_f)  # tanh + exp
    bytes_accessed = (2 * n * n + 2 * n * in_pad + param_bytes
                      + 4 * n * pad_f * num_layers)

    kernel = functools.partial(_gcn_hete_kernel, num_layers=num_layers,
                               order=order, pad_f=pad_f, active=active)
    outs = pl.pallas_call(
        kernel,
        out_shape=[jax.ShapeDtypeStruct((n, pad_f), jnp.float32)] * num_layers,
        in_specs=[_VMEM] * (2 + 6 * num_layers),
        out_specs=[_VMEM] * num_layers,
        compiler_params=pltpu.CompilerParams(vmem_limit_bytes=vmem_limit),
        cost_estimate=pl.CostEstimate(flops=flops,
                                      transcendentals=transcendentals,
                                      bytes_accessed=bytes_accessed),
    )(adj_b, x, *packed)
    return tuple(o[:, :out_f] for o in outs)


# ----------------------------------------------------------------------------
# Deterministic parameter init (matches shapes / init scheme of the module)
# ----------------------------------------------------------------------------
def init_graph_conv(key, in_f, out_f, reduction=4, order=3):
    keys = jax.random.split(key, 2 * order + 4)
    ws, bs = [], []
    for i in range(order):
        bound = math.sqrt(6.0 / (in_f + out_f))            # xavier_uniform_
        ws.append(jax.random.uniform(keys[2 * i], (in_f, out_f), jnp.float32,
                                     -bound, bound))
        stdv = 1.0 / math.sqrt(out_f)
        bs.append(jax.random.uniform(keys[2 * i + 1], (out_f,), jnp.float32,
                                     -stdv, stdv))
    hid = out_f // reduction
    k1 = 1.0 / math.sqrt(out_f)
    fc1_w = jax.random.uniform(keys[2 * order + 0], (hid, out_f), jnp.float32, -k1, k1)
    fc1_b = jax.random.uniform(keys[2 * order + 1], (hid,), jnp.float32, -k1, k1)
    k2 = 1.0 / math.sqrt(hid)
    fc2_w = jax.random.uniform(keys[2 * order + 2], (out_f, hid), jnp.float32, -k2, k2)
    fc2_b = jax.random.uniform(keys[2 * order + 3], (out_f,), jnp.float32, -k2, k2)
    return dict(w=ws, b=bs, fc1_w=fc1_w, fc1_b=fc1_b, fc2_w=fc2_w, fc2_b=fc2_b)


# ----------------------------------------------------------------------------
# Demo
# ----------------------------------------------------------------------------
if __name__ == "__main__":
    N = 16            # number of graph nodes
    hidden_c = 32     # input feature dim
    output_hete = 32  # output feature dim

    key = jax.random.PRNGKey(0)
    k_adj, k_feat, k1, k2, k3 = jax.random.split(key, 5)

    adj = jax.random.uniform(k_adj, (N, N), jnp.float32)
    adj = adj / jnp.sum(adj, axis=1, keepdims=True)      # row-normalized dense adj
    features = jax.random.normal(k_feat, (N, hidden_c), jnp.float32)

    p_hete = init_graph_conv(k1, hidden_c, output_hete)
    p_hete2 = init_graph_conv(k2, output_hete, output_hete)
    p_hete3 = init_graph_conv(k3, output_hete, output_hete)

    forward = jax.jit(gcn_hete_forward)
    out1, out2, out3 = forward(adj, features, p_hete, p_hete2, p_hete3)
    jax.block_until_ready((out1, out2, out3))

    assert out1.shape == (N, output_hete)
    assert out2.shape == (N, output_hete)
    assert out3.shape == (N, output_hete)
    assert bool(jnp.all(jnp.isfinite(out1)))
    assert bool(jnp.all(jnp.isfinite(out2)))
    assert bool(jnp.all(jnp.isfinite(out3)))
    print("KERNEL_OK")
</pallas_src>

<mosaic_0001>
module attributes {stable_mosaic.version = 11 : i64} {
  func.func @_gcn_hete_kernel(%arg0: memref<16x16xbf16, #tpu.memory_space<vmem>>, %arg1: memref<16x128xbf16, #tpu.memory_space<vmem>>, %arg2: memref<128x384xbf16, #tpu.memory_space<vmem>>, %arg3: memref<3x128xf32, #tpu.memory_space<vmem>>, %arg4: memref<128x8xf32, #tpu.memory_space<vmem>>, %arg5: memref<1x8xf32, #tpu.memory_space<vmem>>, %arg6: memref<8x128xf32, #tpu.memory_space<vmem>>, %arg7: memref<1x128xf32, #tpu.memory_space<vmem>>, %arg8: memref<128x384xbf16, #tpu.memory_space<vmem>>, %arg9: memref<3x128xf32, #tpu.memory_space<vmem>>, %arg10: memref<128x8xf32, #tpu.memory_space<vmem>>, %arg11: memref<1x8xf32, #tpu.memory_space<vmem>>, %arg12: memref<8x128xf32, #tpu.memory_space<vmem>>, %arg13: memref<1x128xf32, #tpu.memory_space<vmem>>, %arg14: memref<128x384xbf16, #tpu.memory_space<vmem>>, %arg15: memref<3x128xf32, #tpu.memory_space<vmem>>, %arg16: memref<128x8xf32, #tpu.memory_space<vmem>>, %arg17: memref<1x8xf32, #tpu.memory_space<vmem>>, %arg18: memref<8x128xf32, #tpu.memory_space<vmem>>, %arg19: memref<1x128xf32, #tpu.memory_space<vmem>>, %arg20: memref<16x128xf32, #tpu.memory_space<vmem>>, %arg21: memref<16x128xf32, #tpu.memory_space<vmem>>, %arg22: memref<16x128xf32, #tpu.memory_space<vmem>>) attributes {dimension_semantics = [], scalar_prefetch = 0 : i64, scratch_operands = 0 : i64, tpu.core_type = #tpu.core_type<tc>} {
    %c0 = arith.constant 0 : index
    %c0_0 = arith.constant 0 : index
    %0 = vector.load %arg0[%c0, %c0_0] : memref<16x16xbf16, #tpu.memory_space<vmem>>, vector<16x16xbf16>
    %c0_1 = arith.constant 0 : index
    %c0_2 = arith.constant 0 : index
    %1 = vector.load %arg1[%c0_1, %c0_2] : memref<16x128xbf16, #tpu.memory_space<vmem>>, vector<16x128xbf16>
    %c0_3 = arith.constant 0 : index
    %c0_4 = arith.constant 0 : index
    %2 = vector.load %arg2[%c0_3, %c0_4] : memref<128x384xbf16, #tpu.memory_space<vmem>>, vector<128x384xbf16>
    %cst = arith.constant dense<0.000000e+00> : vector<16x384xf32>
    %3 = tpu.matmul %1, %2, %cst {dimension_numbers = #tpu.dot_dimension_numbers<[1], [0], [0], [1], [0, 0, 1, 1], [], []>} : vector<16x128xbf16>, vector<128x384xbf16>, vector<16x384xf32> -> vector<16x384xf32>
    %4 = math.tanh %3 : vector<16x384xf32>
    %c0_5 = arith.constant 0 : index
    %c0_6 = arith.constant 0 : index
    %5 = vector.load %arg3[%c0_5, %c0_6] : memref<3x128xf32, #tpu.memory_space<vmem>>, vector<3x128xf32>
    %6 = arith.truncf %4 : vector<16x384xf32> to vector<16x384xbf16>
    %cst_7 = arith.constant dense<0.000000e+00> : vector<16x384xf32>
    %7 = tpu.matmul %0, %6, %cst_7 {dimension_numbers = #tpu.dot_dimension_numbers<[1], [0], [0], [1], [0, 0, 1, 1], [], []>} : vector<16x16xbf16>, vector<16x384xbf16>, vector<16x384xf32> -> vector<16x384xf32>
    %8 = vector.extract_strided_slice %7 {offsets = [0, 0], sizes = [16, 128], strides = [1, 1]} : vector<16x384xf32> to vector<16x128xf32>
    %9 = vector.extract_strided_slice %5 {offsets = [0, 0], sizes = [1, 128], strides = [1, 1]} : vector<3x128xf32> to vector<1x128xf32>
    %10 = vector.broadcast %9 : vector<1x128xf32> to vector<16x128xf32>
    %11 = arith.addf %8, %10 : vector<16x128xf32>
    %12 = vector.extract_strided_slice %7 {offsets = [0, 128], sizes = [16, 256], strides = [1, 1]} : vector<16x384xf32> to vector<16x256xf32>
    %13 = arith.truncf %12 : vector<16x256xf32> to vector<16x256xbf16>
    %cst_8 = arith.constant dense<0.000000e+00> : vector<16x256xf32>
    %14 = tpu.matmul %0, %13, %cst_8 {dimension_numbers = #tpu.dot_dimension_numbers<[1], [0], [0], [1], [0, 0, 1, 1], [], []>} : vector<16x16xbf16>, vector<16x256xbf16>, vector<16x256xf32> -> vector<16x256xf32>
    %15 = vector.extract_strided_slice %14 {offsets = [0, 0], sizes = [16, 128], strides = [1, 1]} : vector<16x256xf32> to vector<16x128xf32>
    %16 = vector.extract_strided_slice %5 {offsets = [1, 0], sizes = [1, 128], strides = [1, 1]} : vector<3x128xf32> to vector<1x128xf32>
    %17 = vector.broadcast %16 : vector<1x128xf32> to vector<16x128xf32>
    %18 = arith.addf %15, %17 : vector<16x128xf32>
    %19 = vector.extract_strided_slice %14 {offsets = [0, 128], sizes = [16, 128], strides = [1, 1]} : vector<16x256xf32> to vector<16x128xf32>
    %20 = arith.truncf %19 : vector<16x128xf32> to vector<16x128xbf16>
    %cst_9 = arith.constant dense<0.000000e+00> : vector<16x128xf32>
    %21 = tpu.matmul %0, %20, %cst_9 {dimension_numbers = #tpu.dot_dimension_numbers<[1], [0], [0], [1], [0, 0, 1, 1], [], []>} : vector<16x16xbf16>, vector<16x128xbf16>, vector<16x128xf32> -> vector<16x128xf32>
    %22 = vector.extract_strided_slice %5 {offsets = [2, 0], sizes = [1, 128], strides = [1, 1]} : vector<3x128xf32> to vector<1x128xf32>
    %23 = vector.broadcast %22 : vector<1x128xf32> to vector<16x128xf32>
    %24 = arith.addf %21, %23 : vector<16x128xf32>
    %cst_10 = arith.constant dense<0.000000e+00> : vector<128xf32>
    %25 = vector.multi_reduction <add>, %11, %cst_10 [0] : vector<16x128xf32> to vector<128xf32>
    %26 = vector.shape_cast %25 : vector<128xf32> to vector<1x128xf32>
    %cst_11 = arith.constant 1.600000e+01 : f32
    %27 = vector.broadcast %cst_11 : f32 to vector<1x128xf32>
    %28 = arith.divf %26, %27 : vector<1x128xf32>
    %cst_12 = arith.constant dense<0.000000e+00> : vector<128xf32>
    %29 = vector.multi_reduction <add>, %18, %cst_12 [0] : vector<16x128xf32> to vector<128xf32>
    %30 = vector.shape_cast %29 : vector<128xf32> to vector<1x128xf32>
    %cst_13 = arith.constant 1.600000e+01 : f32
    %31 = vector.broadcast %cst_13 : f32 to vector<1x128xf32>
    %32 = arith.divf %30, %31 : vector<1x128xf32>
    %cst_14 = arith.constant dense<0.000000e+00> : vector<128xf32>
    %33 = vector.multi_reduction <add>, %24, %cst_14 [0] : vector<16x128xf32> to vector<128xf32>
    %34 = vector.shape_cast %33 : vector<128xf32> to vector<1x128xf32>
    %cst_15 = arith.constant 1.600000e+01 : f32
    %35 = vector.broadcast %cst_15 : f32 to vector<1x128xf32>
    %36 = arith.divf %34, %35 : vector<1x128xf32>
    %37 = tpu.concatenate %28, %32, %36 in 0 : vector<1x128xf32>, vector<1x128xf32>, vector<1x128xf32> -> vector<3x128xf32>
    %c0_16 = arith.constant 0 : index
    %c0_17 = arith.constant 0 : index
    %38 = vector.load %arg4[%c0_16, %c0_17] : memref<128x8xf32, #tpu.memory_space<vmem>>, vector<128x8xf32>
    %cst_18 = arith.constant dense<0.000000e+00> : vector<3x8xf32>
    %39 = tpu.matmul %37, %38, %cst_18 {dimension_numbers = #tpu.dot_dimension_numbers<[1], [0], [0], [1], [0, 0, 1, 1], [], []>} : vector<3x128xf32>, vector<128x8xf32>, vector<3x8xf32> -> vector<3x8xf32>
    %c0_19 = arith.constant 0 : index
    %c0_20 = arith.constant 0 : index
    %40 = vector.load %arg5[%c0_19, %c0_20] : memref<1x8xf32, #tpu.memory_space<vmem>>, vector<1x8xf32>
    %41 = vector.broadcast %40 : vector<1x8xf32> to vector<3x8xf32>
    %42 = arith.addf %39, %41 : vector<3x8xf32>
    %cst_21 = arith.constant 0.000000e+00 : f32
    %43 = vector.broadcast %cst_21 : f32 to vector<3x8xf32>
    %44 = arith.maximumf %42, %43 : vector<3x8xf32>
    %c0_22 = arith.constant 0 : index
    %c0_23 = arith.constant 0 : index
    %45 = vector.load %arg6[%c0_22, %c0_23] : memref<8x128xf32, #tpu.memory_space<vmem>>, vector<8x128xf32>
    %cst_24 = arith.constant dense<0.000000e+00> : vector<3x128xf32>
    %46 = tpu.matmul %44, %45, %cst_24 {dimension_numbers = #tpu.dot_dimension_numbers<[1], [0], [0], [1], [0, 0, 1, 1], [], []>} : vector<3x8xf32>, vector<8x128xf32>, vector<3x128xf32> -> vector<3x128xf32>
    %c0_25 = arith.constant 0 : index
    %c0_26 = arith.constant 0 : index
    %47 = vector.load %arg7[%c0_25, %c0_26] : memref<1x128xf32, #tpu.memory_space<vmem>>, vector<1x128xf32>
    %48 = vector.broadcast %47 : vector<1x128xf32> to vector<3x128xf32>
    %49 = arith.addf %46, %48 : vector<3x128xf32>
    %cst_27 = arith.constant dense<0xFF800000> : vector<128xf32>
    %50 = vector.multi_reduction <maximumf>, %49, %cst_27 [0] : vector<3x128xf32> to vector<128xf32>
    %51 = vector.shape_cast %50 : vector<128xf32> to vector<1x128xf32>
    %52 = vector.broadcast %51 : vector<1x128xf32> to vector<3x128xf32>
    %53 = arith.subf %49, %52 : vector<3x128xf32>
    %54 = math.exp %53 : vector<3x128xf32>
    %cst_28 = arith.constant dense<0.000000e+00> : vector<128xf32>
    %55 = vector.multi_reduction <add>, %54, %cst_28 [0] : vector<3x128xf32> to vector<128xf32>
    %56 = vector.shape_cast %55 : vector<128xf32> to vector<1x128xf32>
    %57 = tpu.reciprocal %56 : vector<1x128xf32> -> vector<1x128xf32>
    %58 = vector.broadcast %57 : vector<1x128xf32> to vector<3x128xf32>
    %59 = arith.mulf %54, %58 : vector<3x128xf32>
    %60 = vector.extract_strided_slice %59 {offsets = [0, 0], sizes = [1, 128], strides = [1, 1]} : vector<3x128xf32> to vector<1x128xf32>
    %61 = vector.broadcast %60 : vector<1x128xf32> to vector<16x128xf32>
    %62 = arith.mulf %11, %61 : vector<16x128xf32>
    %63 = vector.extract_strided_slice %59 {offsets = [1, 0], sizes = [1, 128], strides = [1, 1]} : vector<3x128xf32> to vector<1x128xf32>
    %64 = vector.broadcast %63 : vector<1x128xf32> to vector<16x128xf32>
    %65 = arith.mulf %18, %64 : vector<16x128xf32>
    %66 = arith.addf %62, %65 : vector<16x128xf32>
    %67 = vector.extract_strided_slice %59 {offsets = [2, 0], sizes = [1, 128], strides = [1, 1]} : vector<3x128xf32> to vector<1x128xf32>
    %68 = vector.broadcast %67 : vector<1x128xf32> to vector<16x128xf32>
    %69 = arith.mulf %24, %68 : vector<16x128xf32>
    %70 = arith.addf %66, %69 : vector<16x128xf32>
    %cst_29 = arith.constant 0.000000e+00 : f32
    %71 = vector.broadcast %cst_29 : f32 to vector<16x128xf32>
    %72 = arith.maximumf %70, %71 : vector<16x128xf32>
    %c0_30 = arith.constant 0 : index
    %c0_31 = arith.constant 0 : index
    %73 = vector.load %arg20[%c0_30, %c0_31] : memref<16x128xf32, #tpu.memory_space<vmem>>, vector<16x128xf32>
    tpu.vector_store %arg20[%c0_30, %c0_31], %72 {strides = array<i32>} : memref<16x128xf32, #tpu.memory_space<vmem>>, vector<16x128xf32>,
    %74 = arith.truncf %72 : vector<16x128xf32> to vector<16x128xbf16>
    %c0_32 = arith.constant 0 : index
    %c0_33 = arith.constant 0 : index
    %75 = vector.load %arg8[%c0_32, %c0_33] : memref<128x384xbf16, #tpu.memory_space<vmem>>, vector<128x384xbf16>
    %cst_34 = arith.constant dense<0.000000e+00> : vector<16x384xf32>
    %76 = tpu.matmul %74, %75, %cst_34 {dimension_numbers = #tpu.dot_dimension_numbers<[1], [0], [0], [1], [0, 0, 1, 1], [], []>} : vector<16x128xbf16>, vector<128x384xbf16>, vector<16x384xf32> -> vector<16x384xf32>
    %77 = math.tanh %76 : vector<16x384xf32>
    %c0_35 = arith.constant 0 : index
    %c0_36 = arith.constant 0 : index
    %78 = vector.load %arg9[%c0_35, %c0_36] : memref<3x128xf32, #tpu.memory_space<vmem>>, vector<3x128xf32>
    %79 = arith.truncf %77 : vector<16x384xf32> to vector<16x384xbf16>
    %cst_37 = arith.constant dense<0.000000e+00> : vector<16x384xf32>
    %80 = tpu.matmul %0, %79, %cst_37 {dimension_numbers = #tpu.dot_dimension_numbers<[1], [0], [0], [1], [0, 0, 1, 1], [], []>} : vector<16x16xbf16>, vector<16x384xbf16>, vector<16x384xf32> -> vector<16x384xf32>
    %81 = vector.extract_strided_slice %80 {offsets = [0, 0], sizes = [16, 128], strides = [1, 1]} : vector<16x384xf32> to vector<16x128xf32>
    %82 = vector.extract_strided_slice %78 {offsets = [0, 0], sizes = [1, 128], strides = [1, 1]} : vector<3x128xf32> to vector<1x128xf32>
    %83 = vector.broadcast %82 : vector<1x128xf32> to vector<16x128xf32>
    %84 = arith.addf %81, %83 : vector<16x128xf32>
    %85 = vector.extract_strided_slice %80 {offsets = [0, 128], sizes = [16, 256], strides = [1, 1]} : vector<16x384xf32> to vector<16x256xf32>
    %86 = arith.truncf %85 : vector<16x256xf32> to vector<16x256xbf16>
    %cst_38 = arith.constant dense<0.000000e+00> : vector<16x256xf32>
    %87 = tpu.matmul %0, %86, %cst_38 {dimension_numbers = #tpu.dot_dimension_numbers<[1], [0], [0], [1], [0, 0, 1, 1], [], []>} : vector<16x16xbf16>, vector<16x256xbf16>, vector<16x256xf32> -> vector<16x256xf32>
    %88 = vector.extract_strided_slice %87 {offsets = [0, 0], sizes = [16, 128], strides = [1, 1]} : vector<16x256xf32> to vector<16x128xf32>
    %89 = vector.extract_strided_slice %78 {offsets = [1, 0], sizes = [1, 128], strides = [1, 1]} : vector<3x128xf32> to vector<1x128xf32>
    %90 = vector.broadcast %89 : vector<1x128xf32> to vector<16x128xf32>
    %91 = arith.addf %88, %90 : vector<16x128xf32>
    %92 = vector.extract_strided_slice %87 {offsets = [0, 128], sizes = [16, 128], strides = [1, 1]} : vector<16x256xf32> to vector<16x128xf32>
    %93 = arith.truncf %92 : vector<16x128xf32> to vector<16x128xbf16>
    %cst_39 = arith.constant dense<0.000000e+00> : vector<16x128xf32>
    %94 = tpu.matmul %0, %93, %cst_39 {dimension_numbers = #tpu.dot_dimension_numbers<[1], [0], [0], [1], [0, 0, 1, 1], [], []>} : vector<16x16xbf16>, vector<16x128xbf16>, vector<16x128xf32> -> vector<16x128xf32>
    %95 = vector.extract_strided_slice %78 {offsets = [2, 0], sizes = [1, 128], strides = [1, 1]} : vector<3x128xf32> to vector<1x128xf32>
    %96 = vector.broadcast %95 : vector<1x128xf32> to vector<16x128xf32>
    %97 = arith.addf %94, %96 : vector<16x128xf32>
    %cst_40 = arith.constant dense<0.000000e+00> : vector<128xf32>
    %98 = vector.multi_reduction <add>, %84, %cst_40 [0] : vector<16x128xf32> to vector<128xf32>
    %99 = vector.shape_cast %98 : vector<128xf32> to vector<1x128xf32>
    %cst_41 = arith.constant 1.600000e+01 : f32
    %100 = vector.broadcast %cst_41 : f32 to vector<1x128xf32>
    %101 = arith.divf %99, %100 : vector<1x128xf32>
    %cst_42 = arith.constant dense<0.000000e+00> : vector<128xf32>
    %102 = vector.multi_reduction <add>, %91, %cst_42 [0] : vector<16x128xf32> to vector<128xf32>
    %103 = vector.shape_cast %102 : vector<128xf32> to vector<1x128xf32>
    %cst_43 = arith.constant 1.600000e+01 : f32
    %104 = vector.broadcast %cst_43 : f32 to vector<1x128xf32>
    %105 = arith.divf %103, %104 : vector<1x128xf32>
    %cst_44 = arith.constant dense<0.000000e+00> : vector<128xf32>
    %106 = vector.multi_reduction <add>, %97, %cst_44 [0] : vector<16x128xf32> to vector<128xf32>
    %107 = vector.shape_cast %106 : vector<128xf32> to vector<1x128xf32>
    %cst_45 = arith.constant 1.600000e+01 : f32
    %108 = vector.broadcast %cst_45 : f32 to vector<1x128xf32>
    %109 = arith.divf %107, %108 : vector<1x128xf32>
    %110 = tpu.concatenate %101, %105, %109 in 0 : vector<1x128xf32>, vector<1x128xf32>, vector<1x128xf32> -> vector<3x128xf32>
    %c0_46 = arith.constant 0 : index
    %c0_47 = arith.constant 0 : index
    %111 = vector.load %arg10[%c0_46, %c0_47] : memref<128x8xf32, #tpu.memory_space<vmem>>, vector<128x8xf32>
    %cst_48 = arith.constant dense<0.000000e+00> : vector<3x8xf32>
    %112 = tpu.matmul %110, %111, %cst_48 {dimension_numbers = #tpu.dot_dimension_numbers<[1], [0], [0], [1], [0, 0, 1, 1], [], []>} : vector<3x128xf32>, vector<128x8xf32>, vector<3x8xf32> -> vector<3x8xf32>
    %c0_49 = arith.constant 0 : index
    %c0_50 = arith.constant 0 : index
    %113 = vector.load %arg11[%c0_49, %c0_50] : memref<1x8xf32, #tpu.memory_space<vmem>>, vector<1x8xf32>
    %114 = vector.broadcast %113 : vector<1x8xf32> to vector<3x8xf32>
    %115 = arith.addf %112, %114 : vector<3x8xf32>
    %cst_51 = arith.constant 0.000000e+00 : f32
    %116 = vector.broadcast %cst_51 : f32 to vector<3x8xf32>
    %117 = arith.maximumf %115, %116 : vector<3x8xf32>
    %c0_52 = arith.constant 0 : index
    %c0_53 = arith.constant 0 : index
    %118 = vector.load %arg12[%c0_52, %c0_53] : memref<8x128xf32, #tpu.memory_space<vmem>>, vector<8x128xf32>
    %cst_54 = arith.constant dense<0.000000e+00> : vector<3x128xf32>
    %119 = tpu.matmul %117, %118, %cst_54 {dimension_numbers = #tpu.dot_dimension_numbers<[1], [0], [0], [1], [0, 0, 1, 1], [], []>} : vector<3x8xf32>, vector<8x128xf32>, vector<3x128xf32> -> vector<3x128xf32>
    %c0_55 = arith.constant 0 : index
    %c0_56 = arith.constant 0 : index
    %120 = vector.load %arg13[%c0_55, %c0_56] : memref<1x128xf32, #tpu.memory_space<vmem>>, vector<1x128xf32>
    %121 = vector.broadcast %120 : vector<1x128xf32> to vector<3x128xf32>
    %122 = arith.addf %119, %121 : vector<3x128xf32>
    %cst_57 = arith.constant dense<0xFF800000> : vector<128xf32>
    %123 = vector.multi_reduction <maximumf>, %122, %cst_57 [0] : vector<3x128xf32> to vector<128xf32>
    %124 = vector.shape_cast %123 : vector<128xf32> to vector<1x128xf32>
    %125 = vector.broadcast %124 : vector<1x128xf32> to vector<3x128xf32>
    %126 = arith.subf %122, %125 : vector<3x128xf32>
    %127 = math.exp %126 : vector<3x128xf32>
    %cst_58 = arith.constant dense<0.000000e+00> : vector<128xf32>
    %128 = vector.multi_reduction <add>, %127, %cst_58 [0] : vector<3x128xf32> to vector<128xf32>
    %129 = vector.shape_cast %128 : vector<128xf32> to vector<1x128xf32>
    %130 = tpu.reciprocal %129 : vector<1x128xf32> -> vector<1x128xf32>
    %131 = vector.broadcast %130 : vector<1x128xf32> to vector<3x128xf32>
    %132 = arith.mulf %127, %131 : vector<3x128xf32>
    %133 = vector.extract_strided_slice %132 {offsets = [0, 0], sizes = [1, 128], strides = [1, 1]} : vector<3x128xf32> to vector<1x128xf32>
    %134 = vector.broadcast %133 : vector<1x128xf32> to vector<16x128xf32>
    %135 = arith.mulf %84, %134 : vector<16x128xf32>
    %136 = vector.extract_strided_slice %132 {offsets = [1, 0], sizes = [1, 128], strides = [1, 1]} : vector<3x128xf32> to vector<1x128xf32>
    %137 = vector.broadcast %136 : vector<1x128xf32> to vector<16x128xf32>
    %138 = arith.mulf %91, %137 : vector<16x128xf32>
    %139 = arith.addf %135, %138 : vector<16x128xf32>
    %140 = vector.extract_strided_slice %132 {offsets = [2, 0], sizes = [1, 128], strides = [1, 1]} : vector<3x128xf32> to vector<1x128xf32>
    %141 = vector.broadcast %140 : vector<1x128xf32> to vector<16x128xf32>
    %142 = arith.mulf %97, %141 : vector<16x128xf32>
    %143 = arith.addf %139, %142 : vector<16x128xf32>
    %cst_59 = arith.constant 0.000000e+00 : f32
    %144 = vector.broadcast %cst_59 : f32 to vector<16x128xf32>
    %145 = arith.maximumf %143, %144 : vector<16x128xf32>
    %c0_60 = arith.constant 0 : index
    %c0_61 = arith.constant 0 : index
    %146 = vector.load %arg21[%c0_60, %c0_61] : memref<16x128xf32, #tpu.memory_space<vmem>>, vector<16x128xf32>
    tpu.vector_store %arg21[%c0_60, %c0_61], %145 {strides = array<i32>} : memref<16x128xf32, #tpu.memory_space<vmem>>, vector<16x128xf32>,
    %147 = arith.truncf %145 : vector<16x128xf32> to vector<16x128xbf16>
    %c0_62 = arith.constant 0 : index
    %c0_63 = arith.constant 0 : index
    %148 = vector.load %arg14[%c0_62, %c0_63] : memref<128x384xbf16, #tpu.memory_space<vmem>>, vector<128x384xbf16>
    %cst_64 = arith.constant dense<0.000000e+00> : vector<16x384xf32>
    %149 = tpu.matmul %147, %148, %cst_64 {dimension_numbers = #tpu.dot_dimension_numbers<[1], [0], [0], [1], [0, 0, 1, 1], [], []>} : vector<16x128xbf16>, vector<128x384xbf16>, vector<16x384xf32> -> vector<16x384xf32>
    %150 = math.tanh %149 : vector<16x384xf32>
    %c0_65 = arith.constant 0 : index
    %c0_66 = arith.constant 0 : index
    %151 = vector.load %arg15[%c0_65, %c0_66] : memref<3x128xf32, #tpu.memory_space<vmem>>, vector<3x128xf32>
    %152 = arith.truncf %150 : vector<16x384xf32> to vector<16x384xbf16>
    %cst_67 = arith.constant dense<0.000000e+00> : vector<16x384xf32>
    %153 = tpu.matmul %0, %152, %cst_67 {dimension_numbers = #tpu.dot_dimension_numbers<[1], [0], [0], [1], [0, 0, 1, 1], [], []>} : vector<16x16xbf16>, vector<16x384xbf16>, vector<16x384xf32> -> vector<16x384xf32>
    %154 = vector.extract_strided_slice %153 {offsets = [0, 0], sizes = [16, 128], strides = [1, 1]} : vector<16x384xf32> to vector<16x128xf32>
    %155 = vector.extract_strided_slice %151 {offsets = [0, 0], sizes = [1, 128], strides = [1, 1]} : vector<3x128xf32> to vector<1x128xf32>
    %156 = vector.broadcast %155 : vector<1x128xf32> to vector<16x128xf32>
    %157 = arith.addf %154, %156 : vector<16x128xf32>
    %158 = vector.extract_strided_slice %153 {offsets = [0, 128], sizes = [16, 256], strides = [1, 1]} : vector<16x384xf32> to vector<16x256xf32>
    %159 = arith.truncf %158 : vector<16x256xf32> to vector<16x256xbf16>
    %cst_68 = arith.constant dense<0.000000e+00> : vector<16x256xf32>
    %160 = tpu.matmul %0, %159, %cst_68 {dimension_numbers = #tpu.dot_dimension_numbers<[1], [0], [0], [1], [0, 0, 1, 1], [], []>} : vector<16x16xbf16>, vector<16x256xbf16>, vector<16x256xf32> -> vector<16x256xf32>
    %161 = vector.extract_strided_slice %160 {offsets = [0, 0], sizes = [16, 128], strides = [1, 1]} : vector<16x256xf32> to vector<16x128xf32>
    %162 = vector.extract_strided_slice %151 {offsets = [1, 0], sizes = [1, 128], strides = [1, 1]} : vector<3x128xf32> to vector<1x128xf32>
    %163 = vector.broadcast %162 : vector<1x128xf32> to vector<16x128xf32>
    %164 = arith.addf %161, %163 : vector<16x128xf32>
    %165 = vector.extract_strided_slice %160 {offsets = [0, 128], sizes = [16, 128], strides = [1, 1]} : vector<16x256xf32> to vector<16x128xf32>
    %166 = arith.truncf %165 : vector<16x128xf32> to vector<16x128xbf16>
    %cst_69 = arith.constant dense<0.000000e+00> : vector<16x128xf32>
    %167 = tpu.matmul %0, %166, %cst_69 {dimension_numbers = #tpu.dot_dimension_numbers<[1], [0], [0], [1], [0, 0, 1, 1], [], []>} : vector<16x16xbf16>, vector<16x128xbf16>, vector<16x128xf32> -> vector<16x128xf32>
    %168 = vector.extract_strided_slice %151 {offsets = [2, 0], sizes = [1, 128], strides = [1, 1]} : vector<3x128xf32> to vector<1x128xf32>
    %169 = vector.broadcast %168 : vector<1x128xf32> to vector<16x128xf32>
    %170 = arith.addf %167, %169 : vector<16x128xf32>
    %cst_70 = arith.constant dense<0.000000e+00> : vector<128xf32>
    %171 = vector.multi_reduction <add>, %157, %cst_70 [0] : vector<16x128xf32> to vector<128xf32>
    %172 = vector.shape_cast %171 : vector<128xf32> to vector<1x128xf32>
    %cst_71 = arith.constant 1.600000e+01 : f32
    %173 = vector.broadcast %cst_71 : f32 to vector<1x128xf32>
    %174 = arith.divf %172, %173 : vector<1x128xf32>
    %cst_72 = arith.constant dense<0.000000e+00> : vector<128xf32>
    %175 = vector.multi_reduction <add>, %164, %cst_72 [0] : vector<16x128xf32> to vector<128xf32>
    %176 = vector.shape_cast %175 : vector<128xf32> to vector<1x128xf32>
    %cst_73 = arith.constant 1.600000e+01 : f32
    %177 = vector.broadcast %cst_73 : f32 to vector<1x128xf32>
    %178 = arith.divf %176, %177 : vector<1x128xf32>
    %cst_74 = arith.constant dense<0.000000e+00> : vector<128xf32>
    %179 = vector.multi_reduction <add>, %170, %cst_74 [0] : vector<16x128xf32> to vector<128xf32>
    %180 = vector.shape_cast %179 : vector<128xf32> to vector<1x128xf32>
    %cst_75 = arith.constant 1.600000e+01 : f32
    %181 = vector.broadcast %cst_75 : f32 to vector<1x128xf32>
    %182 = arith.divf %180, %181 : vector<1x128xf32>
    %183 = tpu.concatenate %174, %178, %182 in 0 : vector<1x128xf32>, vector<1x128xf32>, vector<1x128xf32> -> vector<3x128xf32>
    %c0_76 = arith.constant 0 : index
    %c0_77 = arith.constant 0 : index
    %184 = vector.load %arg16[%c0_76, %c0_77] : memref<128x8xf32, #tpu.memory_space<vmem>>, vector<128x8xf32>
    %cst_78 = arith.constant dense<0.000000e+00> : vector<3x8xf32>
    %185 = tpu.matmul %183, %184, %cst_78 {dimension_numbers = #tpu.dot_dimension_numbers<[1], [0], [0], [1], [0, 0, 1, 1], [], []>} : vector<3x128xf32>, vector<128x8xf32>, vector<3x8xf32> -> vector<3x8xf32>
    %c0_79 = arith.constant 0 : index
    %c0_80 = arith.constant 0 : index
    %186 = vector.load %arg17[%c0_79, %c0_80] : memref<1x8xf32, #tpu.memory_space<vmem>>, vector<1x8xf32>
    %187 = vector.broadcast %186 : vector<1x8xf32> to vector<3x8xf32>
    %188 = arith.addf %185, %187 : vector<3x8xf32>
    %cst_81 = arith.constant 0.000000e+00 : f32
    %189 = vector.broadcast %cst_81 : f32 to vector<3x8xf32>
    %190 = arith.maximumf %188, %189 : vector<3x8xf32>
    %c0_82 = arith.constant 0 : index
    %c0_83 = arith.constant 0 : index
    %191 = vector.load %arg18[%c0_82, %c0_83] : memref<8x128xf32, #tpu.memory_space<vmem>>, vector<8x128xf32>
    %cst_84 = arith.constant dense<0.000000e+00> : vector<3x128xf32>
    %192 = tpu.matmul %190, %191, %cst_84 {dimension_numbers = #tpu.dot_dimension_numbers<[1], [0], [0], [1], [0, 0, 1, 1], [], []>} : vector<3x8xf32>, vector<8x128xf32>, vector<3x128xf32> -> vector<3x128xf32>
    %c0_85 = arith.constant 0 : index
    %c0_86 = arith.constant 0 : index
    %193 = vector.load %arg19[%c0_85, %c0_86] : memref<1x128xf32, #tpu.memory_space<vmem>>, vector<1x128xf32>
    %194 = vector.broadcast %193 : vector<1x128xf32> to vector<3x128xf32>
    %195 = arith.addf %192, %194 : vector<3x128xf32>
    %cst_87 = arith.constant dense<0xFF800000> : vector<128xf32>
    %196 = vector.multi_reduction <maximumf>, %195, %cst_87 [0] : vector<3x128xf32> to vector<128xf32>
    %197 = vector.shape_cast %196 : vector<128xf32> to vector<1x128xf32>
    %198 = vector.broadcast %197 : vector<1x128xf32> to vector<3x128xf32>
    %199 = arith.subf %195, %198 : vector<3x128xf32>
    %200 = math.exp %199 : vector<3x128xf32>
    %cst_88 = arith.constant dense<0.000000e+00> : vector<128xf32>
    %201 = vector.multi_reduction <add>, %200, %cst_88 [0] : vector<3x128xf32> to vector<128xf32>
    %202 = vector.shape_cast %201 : vector<128xf32> to vector<1x128xf32>
    %203 = tpu.reciprocal %202 : vector<1x128xf32> -> vector<1x128xf32>
    %204 = vector.broadcast %203 : vector<1x128xf32> to vector<3x128xf32>
    %205 = arith.mulf %200, %204 : vector<3x128xf32>
    %206 = vector.extract_strided_slice %205 {offsets = [0, 0], sizes = [1, 128], strides = [1, 1]} : vector<3x128xf32> to vector<1x128xf32>
    %207 = vector.broadcast %206 : vector<1x128xf32> to vector<16x128xf32>
    %208 = arith.mulf %157, %207 : vector<16x128xf32>
    %209 = vector.extract_strided_slice %205 {offsets = [1, 0], sizes = [1, 128], strides = [1, 1]} : vector<3x128xf32> to vector<1x128xf32>
    %210 = vector.broadcast %209 : vector<1x128xf32> to vector<16x128xf32>
    %211 = arith.mulf %164, %210 : vector<16x128xf32>
    %212 = arith.addf %208, %211 : vector<16x128xf32>
    %213 = vector.extract_strided_slice %205 {offsets = [2, 0], sizes = [1, 128], strides = [1, 1]} : vector<3x128xf32> to vector<1x128xf32>
    %214 = vector.broadcast %213 : vector<1x128xf32> to vector<16x128xf32>
    %215 = arith.mulf %170, %214 : vector<16x128xf32>
    %216 = arith.addf %212, %215 : vector<16x128xf32>
    %cst_89 = arith.constant 0.000000e+00 : f32
    %217 = vector.broadcast %cst_89 : f32 to vector<16x128xf32>
    %218 = arith.maximumf %216, %217 : vector<16x128xf32>
    %c0_90 = arith.constant 0 : index
    %c0_91 = arith.constant 0 : index
    %219 = vector.load %arg22[%c0_90, %c0_91] : memref<16x128xf32, #tpu.memory_space<vmem>>, vector<16x128xf32>
    tpu.vector_store %arg22[%c0_90, %c0_91], %218 {strides = array<i32>} : memref<16x128xf32, #tpu.memory_space<vmem>>, vector<16x128xf32>,
    return
  }
}

</mosaic_0001>

<bundles_post_ra>
// kernel: gcn_hete_forward.1
= control target key start
LH: loop header
LB: loop body
LE: loop exit
PB: predicated region body
PF: predicated region fallthrough
CT: control target
= control target key end

     0   :  { %s3738_s0 = inlined_call_operand.vmem [shape: bf16[16,16], index: 0, kind: input, shape index: {}]   ;;  %s3739_s1 = inlined_call_operand.vmem [shape: bf16[16,128], index: 1, kind: input, shape index: {}]   ;;  %s3740_s2 = inlined_call_operand.vmem [shape: bf16[128,384], index: 2, kind: input, shape index: {}]   ;;  %s3741_s3 = inlined_call_operand.vmem [shape: f32[3,128], index: 3, kind: input, shape index: {}]   ;;  %s3742_s4 = inlined_call_operand.vmem [shape: f32[128,8], index: 4, kind: input, shape index: {}]   ;;  %s3743_s5 = inlined_call_operand.vmem [shape: f32[1,8], index: 5, kind: input, shape index: {}]   ;;  %s3744_s6 = inlined_call_operand.vmem [shape: f32[8,128], index: 6, kind: input, shape index: {}]   ;;  %s3745_s7 = inlined_call_operand.vmem [shape: f32[1,128], index: 7, kind: input, shape index: {}]   ;;  %s3746_s8 = inlined_call_operand.vmem [shape: bf16[128,384], index: 8, kind: input, shape index: {}]   ;;  %s3747_s9 = inlined_call_operand.vmem [shape: f32[3,128], index: 9, kind: input, shape index: {}]   ;;  %s3748_s10 = inlined_call_operand.vmem [shape: f32[128,8], index: 10, kind: input, shape index: {}]   ;;  %s3749_s11 = inlined_call_operand.vmem [shape: f32[1,8], index: 11, kind: input, shape index: {}]   ;;  %s3750_s12 = inlined_call_operand.vmem [shape: f32[8,128], index: 12, kind: input, shape index: {}]   ;;  %s3751_s13 = inlined_call_operand.vmem [shape: f32[1,128], index: 13, kind: input, shape index: {}]   ;;  %s3752_s14 = inlined_call_operand.vmem [shape: bf16[128,384], index: 14, kind: input, shape index: {}]   ;;  %s3753_s15 = inlined_call_operand.vmem [shape: f32[3,128], index: 15, kind: input, shape index: {}]   ;;  %s3754_s16 = inlined_call_operand.vmem [shape: f32[128,8], index: 16, kind: input, shape index: {}]   ;;  %s3755_s17 = inlined_call_operand.vmem [shape: f32[1,8], index: 17, kind: input, shape index: {}]   ;;  %s3756_s18 = inlined_call_operand.vmem [shape: f32[8,128], index: 18, kind: input, shape index: {}]   ;;  %s3757_s19 = inlined_call_operand.vmem [shape: f32[1,128], index: 19, kind: input, shape index: {}]   ;;  %s3758_s20 = inlined_call_operand.hbm [shape: f32[16,128], index: 20, kind: output, shape index: {0}]   ;;  %s3759_s21 = inlined_call_operand.hbm [shape: f32[16,128], index: 21, kind: output, shape index: {1}]   ;;  %s3760_s22 = inlined_call_operand.hbm [shape: f32[16,128], index: 22, kind: output, shape index: {2}]  }
   0x1   :  { %3764 = sst [smem:[#allocation9_spill]] %s3738_s0 }
   0x2   :  { %3765 = sst [smem:[#allocation10_spill]] %s3739_s1 }
   0x3   :  { %3766 = sst [smem:[#allocation11_spill]] %s3740_s2 }
   0x4   :  { %3767 = sst [smem:[#allocation12_spill]] %s3741_s3 }
   0x5   :  { %3768 = sst [smem:[#allocation13_spill]] %s3742_s4 }
   0x6   :  { %3769 = sst [smem:[#allocation14_spill]] %s3743_s5 }
   0x7   :  { %3770 = sst [smem:[#allocation15_spill]] %s3744_s6 }
   0x8   :  { %28 = vsyncpa [#allocation3], 0  ;;  %s3771_s29 = sld [smem:[#allocation11_spill]]  ;;  %v2910_v2 = vmov 0.0   ;;  %v2911_v3 = vmov 0   ;;  %vm2912_vm0 = vmmov 0  }
   0x9   :  { %2396 = vmatprep.subr.bf16.mxu1 %v2910_v2  ;;  %273 = vmatprep.mubr.bf16.mxu0 %v2911_v3  ;;  %s3772_s1 = sld [smem:[#allocation10_spill]] }
   0xa   :  { %2412 = vmatprep.mubr.msk.bf16.mxu1 %vm2912_vm0, %v2910_v2 }
   0xe   :  { %v2693_v0 = vld [vmem:[%s3771_s29 + $0x4] ss:$12 sps:$4 sm:$0xff]   ;;  %v2695_v1 = vld [vmem:[%s3771_s29] ss:$12 sps:$4 sm:$0xff]   ;;  %v2696_v4 = vld [vmem:[%s3771_s29 + $0x1c] ss:$12 sps:$4 sm:$0xff]  }
   0xf   :  { %241 = vmatprep.subr.bf16.mxu0 %v2693_v0  ;;  %v2698_v5 = vld [vmem:[%s3771_s29 + $0x18] ss:$12 sps:$4 sm:$0xff]   ;;  %v2699_v6 = vld [vmem:[%s3771_s29 + $0x34] ss:$12 sps:$4 sm:$0xff]   ;;  %v2702_v9 = vld [vmem:[%s3771_s29 + $0x30] ss:$12 sps:$4 sm:$0xff]  }
  0x10   :  { %242 = vmatpush1.bf16.msra.mxu0 %v2695_v1  ;;  %v2701_v7 = vld [vmem:[%s3771_s29 + $0x8] ss:$12 sps:$4 sm:$0xff]   ;;  %v2705_v8 = vld [vmem:[%s3771_s29 + $0x20] ss:$12 sps:$4 sm:$0xff]   ;;  %v2709_v11 = vld [vmem:[%s3771_s29 + $0x38] ss:$12 sps:$4 sm:$0xff]  }
  0x11   :  { %243 = vmatprep.subr.bf16.mxu0 %v2696_v4  ;;  %2397 = vmatpush3.bf16.msra.mxu1 %v2701_v7  ;;  %v2703_v10 = vld [vmem:[%s3771_s29 + $0x4c] ss:$12 sps:$4 sm:$0xff]   ;;  %v2706_v12 = vld [vmem:[%s3771_s29 + $0x48] ss:$12 sps:$4 sm:$0xff]   ;;  %v2707_v13 = vld [vmem:[%s3771_s29 + $0x64] ss:$12 sps:$4 sm:$0xff]  }
  0x12   :  { %2398 = vmatprep.subr.bf16.mxu1 %v2910_v2  ;;  %v2713_v14 = vld [vmem:[%s3771_s29 + $0x50] ss:$12 sps:$4 sm:$0xff]   ;;  %v2710_v15 = vld [vmem:[%s3771_s29 + $0x60] ss:$12 sps:$4 sm:$0xff]   ;;  %v2714_v17 = vld [vmem:[%s3771_s29 + $0x78] ss:$12 sps:$4 sm:$0xff]  }
  0x13   :  { %v2711_v16 = vld [vmem:[%s3771_s29 + $0x7c] ss:$12 sps:$4 sm:$0xff]   ;;  %v2715_v19 = vld [vmem:[%s3771_s29 + $0x94] ss:$12 sps:$4 sm:$0xff]   ;;  %v2719_v22 = vld [vmem:[%s3771_s29 + $0xac] ss:$12 sps:$4 sm:$0xff]  }
  0x14   :  { %244 = vmatpush1.bf16.msra.mxu0 %v2698_v5  ;;  %v2717_v18 = vld [vmem:[%s3771_s29 + $0x68] ss:$12 sps:$4 sm:$0xff]   ;;  %v2721_v20 = vld [vmem:[%s3771_s29 + $0x80] ss:$12 sps:$4 sm:$0xff]   ;;  %v2718_v21 = vld [vmem:[%s3771_s29 + $0x90] ss:$12 sps:$4 sm:$0xff]  }
  0x15   :  { %245 = vmatprep.subr.bf16.mxu0 %v2699_v6  ;;  %2399 = vmatpush3.bf16.msra.mxu1 %v2705_v8  ;;  %v2724_v23 = vld [vmem:[%s3771_s29 + $0x98] ss:$12 sps:$4 sm:$0xff]   ;;  %v2722_v24 = vld [vmem:[%s3771_s29 + $0xa8] ss:$12 sps:$4 sm:$0xff]   ;;  %v2725_v26 = vld [vmem:[%s3771_s29 + $0xb0] ss:$12 sps:$4 sm:$0xff]  }
  0x16   :  { %2400 = vmatprep.subr.bf16.mxu1 %v2910_v2  ;;  %v2723_v25 = vld [vmem:[%s3772_s1] sm:$0xff]  }
  0x18   :  { %246 = vmatpush1.bf16.msra.mxu0 %v2702_v9 }
  0x19   :  { %247 = vmatprep.subr.bf16.mxu0 %v2703_v10  ;;  %2401 = vmatpush3.bf16.msra.mxu1 %v2709_v11 }
  0x1a   :  { %2402 = vmatprep.subr.bf16.mxu1 %v2910_v2 }
  0x1c   :  { %248 = vmatpush1.bf16.msra.mxu0 %v2706_v12 }
  0x1d   :  { %249 = vmatprep.subr.bf16.mxu0 %v2707_v13  ;;  %2403 = vmatpush3.bf16.msra.mxu1 %v2713_v14 }
  0x1e   :  { %2404 = vmatprep.subr.bf16.mxu1 %v2910_v2 }
  0x20   :  { %250 = vmatpush1.bf16.msra.mxu0 %v2710_v15 }
  0x21   :  { %251 = vmatprep.subr.bf16.mxu0 %v2711_v16  ;;  %2405 = vmatpush3.bf16.msra.mxu1 %v2717_v18 }
  0x22   :  { %2406 = vmatprep.subr.bf16.mxu1 %v2910_v2 }
  0x24   :  { %252 = vmatpush1.bf16.msra.mxu0 %v2714_v17 }
  0x25   :  { %253 = vmatprep.subr.bf16.mxu0 %v2715_v19  ;;  %2407 = vmatpush3.bf16.msra.mxu1 %v2721_v20 }
  0x26   :  { %2408 = vmatprep.subr.bf16.mxu1 %v2910_v2 }
  0x28   :  { %254 = vmatpush1.bf16.msra.mxu0 %v2718_v21 }
  0x29   :  { %255 = vmatprep.subr.bf16.mxu0 %v2719_v22  ;;  %2409 = vmatpush3.bf16.msra.mxu1 %v2724_v23 }
  0x2a   :  { %2410 = vmatprep.subr.bf16.mxu1 %v2910_v2 }
  0x2c   :  { %256 = vmatpush1.bf16.msra.mxu0 %v2722_v24 }
  0x2d   :  { %2411 = vmatpush3.bf16.msra.mxu1 %v2725_v26 }
  0x2f   :  { %274 = vmatmul.mubr.bf16.vlgmr.msra.gmra.mrb[0].mxu0 %v2723_v25 }
  0x30   :  { %468 = vmatprep.mubr.bf16.mxu0 %v2911_v3  ;;  %2413 = vmatmul.mubr.bf16.vlgmr.msra.gmra.mrb[0].mxu1 %v2723_v25 }
  0x31   :  { %376 = vmatprep.mubr.bf16.mxu1 %v2911_v3 }
  0x32   :  { %29 = vsyncpa [#allocation5], 0  ;;  %s3773_s25 = sld [smem:[#allocation9_spill]]  ;;  %vm340_vm1 = vcmask 130048   ;;  %s3774_s27 = sld [smem:[#allocation13_spill]]  ;;  %v2913_v58 = vmov 0.0|0.0   ;;  %v428_v23 = vlaneseq }
  0x33   :  { %s3775_s1 = sld [smem:[#allocation12_spill]]  ;;  %vm556_vm2 = vcmask 1040384   ;;  %vm558_vm3 = vcmask 1041408   ;;  %s3776_s24 = sld [smem:[#allocation15_spill]]  ;;  %vm662_vm4 = vcmask 64512   ;;  %vm736_vm5 = vcmask 1042432  }
  0x34   :  { %v429_v24 = vshrl.u32 %v428_v23, 7  ;;  %s3777_s26 = sld [smem:[#allocation14_spill]]  ;;  %v2741_v23 = vld [vmem:[%s3746_s8 + $0x4c] ss:$12 sps:$4 sm:$0xff]  }
  0x36   :  { %v3207_v25 = vsub.s32 1, %v429_v24  ;;  %v3209_v26 = vsub.s32 0, %v429_v24 }
  0x38   :  { %v3125_v43 = vld [vmem:[%s3773_s25] sm:$0xff]   ;;  %v561_v56 = vld [vmem:[%s3774_s27 + $0x8] sm:$0xff]  ;;  %v562_v57 = vld [vmem:[%s3774_s27 + $0x10] sm:$0xff] }
  0x39   :  { %v560_v55 = vld [vmem:[%s3774_s27] sm:$0xff]  ;;  %v563_v60 = vld [vmem:[%s3774_s27 + $0x18] sm:$0xff]  ;;  %v565_v63 = vld [vmem:[%s3774_s27 + $0x28] sm:$0xff] }
  0x3a   :  { %v2613_v59 = vpack.c.bf16 %v561_v56, %v560_v55  ;;  %v2616_v61 = vpack.c.bf16 %v563_v60, %v562_v57  ;;  %v564_v62 = vld [vmem:[%s3774_s27 + $0x20] sm:$0xff]  ;;  %v566_v8 = vld [vmem:[%s3774_s27 + $0x30] sm:$0xff]  ;;  %v567_v9 = vld [vmem:[%s3774_s27 + $0x38] sm:$0xff] }
  0x3b   :  { %v2619_v0 = vpack.c.bf16 %v565_v63, %v564_v62  ;;  %v2622_v10 = vpack.c.bf16 %v567_v9, %v566_v8  ;;  %v568_v11 = vld [vmem:[%s3774_s27 + $0x40] sm:$0xff]  ;;  %v569_v12 = vld [vmem:[%s3774_s27 + $0x48] sm:$0xff]  ;;  %v570_v14 = vld [vmem:[%s3774_s27 + $0x50] sm:$0xff] }
  0x3c   :  { %v2625_v13 = vpack.c.bf16 %v569_v12, %v568_v11  ;;  %v571_v15 = vld [vmem:[%s3774_s27 + $0x58] sm:$0xff]  ;;  %v572_v17 = vld [vmem:[%s3774_s27 + $0x60] sm:$0xff]  ;;  %v573_v18 = vld [vmem:[%s3774_s27 + $0x68] sm:$0xff] }
  0x3d   :  { %v2628_v16 = vpack.c.bf16 %v571_v15, %v570_v14  ;;  %v2631_v19 = vpack.c.bf16 %v573_v18, %v572_v17  ;;  %v574_v20 = vld [vmem:[%s3774_s27 + $0x70] sm:$0xff]  ;;  %v575_v21 = vld [vmem:[%s3774_s27 + $0x78] sm:$0xff]  ;;  %v654_v8 = vld [vmem:[%s3776_s24] sm:$0xff] }
  0x3e   :  { %v2634_v22 = vpack.c.bf16 %v575_v21, %v574_v20  ;;  %v2235_v9 = vld [vmem:[%s3777_s26] ss:$0 sm:$0xff]  ;;  %v2729_v14 = vld [vmem:[%s3746_s8 + $0x4] ss:$12 sps:$4 sm:$0xff]   ;;  %v2733_v17 = vld [vmem:[%s3746_s8 + $0x1c] ss:$12 sps:$4 sm:$0xff]  }
  0x3f   :  { %v2727_v15 = vld [vmem:[%s3746_s8] ss:$12 sps:$4 sm:$0xff]   ;;  %v2731_v18 = vld [vmem:[%s3746_s8 + $0x18] ss:$12 sps:$4 sm:$0xff]   ;;  %v2735_v21 = vld [vmem:[%s3746_s8 + $0x30] ss:$12 sps:$4 sm:$0xff]  }
  0x40   :  { %v2737_v20 = vld [vmem:[%s3746_s8 + $0x34] ss:$12 sps:$4 sm:$0xff]   ;;  %s2915_s26 = smov [#allocation2]  }
  0x41   :  { %s2163_s2 = sshll.u32 %s2915_s26, 4  ;;  %s3672_s2 = int_to_ptr.vmem [resolvable:$true] %s2163_s2 }
 0x102   :  { %v275_v27 = vpop.f32.mrb[0].mxu0 }
 0x103   :  { %2791 = vtanh.f32 %v275_v27  ;;  %v277_v28 = vpop.f32.mrb[1].mxu0  ;;  %v318_v31 = vpop.f32.mrb[0].mxu1  ;;  %v331_v27 = vld [vmem:[%s3775_s1] sm:$0x7] }
 0x104   :  { %2793 = vtanh.f32 %v277_v28  ;;  %v279_v29 = vpop.f32.mrb[2].mxu0  ;;  %v2414_v32 = vpop.f32.mrb[1].mxu1  ;;  %v482_v28 = vrot.slane %v331_v27, %v3207_v25 }
 0x105   :  { %2795 = vtanh.f32 %v279_v29  ;;  %v281_v30 = vpop.f32.mrb[3].mxu0  ;;  %v321_v33 = vpop.f32.mrb[2].mxu1  ;;  %v431_v29 = vrot.slane %v331_v27, %v3209_v26 }
 0x106   :  { %2797 = vtanh.f32 %v281_v30  ;;  %v2415_v34 = vpop.f32.mrb[3].mxu1 }
 0x107   :  { %2799 = vtanh.f32 %v318_v31 }
 0x108   :  { %2801 = vtanh.f32 %v321_v33 }
 0x10d   :  { %v2792_v35 = vpop.eup %2791 }
 0x10e   :  { %v2794_v36 = vpop.eup %2793 }
 0x10f   :  { %v2796_v37 = vpop.eup %2795 }
 0x110   :  { %v2798_v38 = vpop.eup %2797  ;;  %v332_v39 = vpack.c.bf16 %v2796_v37, %v2792_v35 }
 0x111   :  { %v2800_v40 = vpop.eup %2799  ;;  %v333_v41 = vpack.c.bf16 %v2798_v38, %v2794_v36  ;;  %v3230_v38 = vsub.s32 2, %v429_v24  ;;  %v2739_v24 = vld [vmem:[%s3746_s8 + $0x48] ss:$12 sps:$4 sm:$0xff]  }
 0x112   :  { %v2802_v42 = vpop.eup %2801 }
 0x113   :  { %344 = vmatprep.subr.bf16.mxu1 %v333_v41  ;;  %v334_v44 = vpack.c.bf16 %v2802_v42, %v2800_v40  ;;  %v489_v41 = vrot.slane %v331_v27, %v3230_v38  ;;  %v2742_v27 = vld [vmem:[%s3746_s8 + $0x50] ss:$12 sps:$4 sm:$0xff]  }
 0x114   :  { %345 = vmatpush1.bf16.msra.mxu1 %v332_v39 }
 0x115   :  { %2416 = vmatprep.subr.bf16.mxu1 %v2910_v2 }
 0x117   :  { %2231 = vmatmul.mubr.msk.bf16.vlgmr.msra.gmra.mrb[4].mxu1 %vm340_vm1, %v3125_v43 }
 0x118   :  { %2417 = vmatpush3.bf16.msra.mxu1 %v334_v44  ;;  %2418 = vmatprep.mubr.msk.bf16.mxu1 %vm2912_vm0, %v2910_v2 }
 0x119   :  { %2422 = vmatprep.subr.bf16.mxu1 %v2910_v2 }
 0x11f   :  { %2419 = vmatmul.mubr.msk.bf16.vlgmr.msra.gmra.mrb[8].mxu1 %vm340_vm1, %v3125_v43 }
 0x120   :  { %2424 = vmatprep.mubr.msk.bf16.mxu1 %vm2912_vm0, %v2910_v2 }
 0x1ea   :  { %v3137_v45 = vpop.f32.mrb[4].mxu1 }
 0x1eb   :  { %v380_v46 = vpop.f32.mrb[5].mxu1  ;;  %v3224_v33 = vadd.f32 %v431_v29, %v3137_v45 }
 0x1ec   :  { %v3139_v47 = vpop.f32.mrb[6].mxu1 }
 0x1ed   :  { %v384_v48 = vpop.f32.mrb[7].mxu1  ;;  %v3219_v31 = vadd.f32 %v431_v29, %v3139_v47  ;;  %v2743_v29 = vld [vmem:[%s3746_s8 + $0x60] ss:$12 sps:$4 sm:$0xff]  }
 0x1ee   :  { %v434_v49 = vpack.c.bf16 %v384_v48, %v380_v46 }
 0x1ef   :  { %v531_v35 = vadd.f32 %v3219_v31, %v3224_v33 }
 0x1f1   :  { %v532_v37 = vrot.slane %v531_v35, 4 }
 0x1f2   :  { %v421_v50 = vpop.f32.mrb[8].mxu1 }
 0x1f3   :  { %v2420_v51 = vpop.f32.mrb[9].mxu1  ;;  %v533_v40 = vadd.f32 %v532_v37, %v531_v35  ;;  %v2747_v35 = vld [vmem:[%s3746_s8 + $0x78] ss:$12 sps:$4 sm:$0xff]   ;;  %v2750_v37 = vld [vmem:[%s3746_s8 + $0x80] ss:$12 sps:$4 sm:$0xff]  }
 0x1f4   :  { %v424_v52 = vpop.f32.mrb[10].mxu1 }
 0x1f5   :  { %v435_v53 = vpack.c.bf16 %v424_v52, %v421_v50  ;;  %v2421_v54 = vpop.f32.mrb[11].mxu1  ;;  %v534_v47 = vrot.slane %v533_v40, 2 }
 0x1f7   :  { %436 = vmatprep.subr.bf16.mxu0 %v435_v53  ;;  %v535_v53 = vadd.f32 %v534_v47, %v533_v40  ;;  %v2751_v40 = vld [vmem:[%s3746_s8 + $0x90] ss:$12 sps:$4 sm:$0xff]   ;;  %v2236_v47 = vld [vmem:[%s3745_s7] ss:$0 sm:$0xff] }
 0x1f8   :  { %437 = vmatpush1.bf16.msra.mxu0 %v434_v49 }
 0x1f9   :  { %2612 = vmatprep.subr.bf16.mxu0 %v2913_v58  ;;  %v536_v57 = vrot.slane %v535_v53, 1 }
 0x1fb   :  { %2233 = vmatmul.mubr.msk.bf16.vlgmr.msra.gmra.mrb[4].mxu0 %vm340_vm1, %v3125_v43  ;;  %v537_v62 = vadd.f32 %v536_v57, %v535_v53 }
 0x1fc   :  { %2460 = vmatprep.mubr.msk.f32.mxu0 %vm2912_vm0, %v2910_v2  ;;  %2614 = vmatpush3.bf16.msra.mxu0 %v2613_v59 }
 0x1fd   :  { %2615 = vmatprep.subr.bf16.mxu0 %v2913_v58 }
 0x200   :  { %2617 = vmatpush3.bf16.msra.mxu0 %v2616_v61 }
 0x201   :  { %2618 = vmatprep.subr.bf16.mxu0 %v2913_v58 }
 0x204   :  { %2620 = vmatpush3.bf16.msra.mxu0 %v2619_v0 }
 0x205   :  { %2621 = vmatprep.subr.bf16.mxu0 %v2913_v58 }
 0x208   :  { %2623 = vmatpush3.bf16.msra.mxu0 %v2622_v10 }
 0x209   :  { %2624 = vmatprep.subr.bf16.mxu0 %v2913_v58 }
 0x20c   :  { %2626 = vmatpush3.bf16.msra.mxu0 %v2625_v13 }
 0x20d   :  { %2627 = vmatprep.subr.bf16.mxu0 %v2913_v58 }
 0x210   :  { %2629 = vmatpush3.bf16.msra.mxu0 %v2628_v16  ;;  %v2730_v16 = vld [vmem:[%s3746_s8 + $0x8] ss:$12 sps:$4 sm:$0xff]  }
 0x211   :  { %2630 = vmatprep.subr.bf16.mxu0 %v2913_v58 }
 0x214   :  { %2632 = vmatpush3.bf16.msra.mxu0 %v2631_v19  ;;  %v2734_v19 = vld [vmem:[%s3746_s8 + $0x20] ss:$12 sps:$4 sm:$0xff]  }
 0x215   :  { %2633 = vmatprep.subr.bf16.mxu0 %v2913_v58 }
 0x218   :  { %2635 = vmatpush3.bf16.msra.mxu0 %v2634_v22  ;;  %v2738_v22 = vld [vmem:[%s3746_s8 + $0x38] ss:$12 sps:$4 sm:$0xff]  }
 0x219   :  { %2468 = vmatprep.subr.bf16.mxu0 %v2910_v2 }
 0x2ce   :  { %v470_v1 = vpop.f32.mrb[4].mxu0 }
 0x2cf   :  { %v472_v4 = vpop.f32.mrb[5].mxu0  ;;  %v3221_v32 = vadd.f32 %v482_v28, %v470_v1 }
 0x2d0   :  { %v474_v5 = vpop.f32.mrb[6].mxu0 }
 0x2d1   :  { %v476_v6 = vpop.f32.mrb[7].mxu0  ;;  %v3216_v30 = vadd.f32 %v482_v28, %v474_v5  ;;  %v2745_v28 = vld [vmem:[%s3746_s8 + $0x64] ss:$12 sps:$4 sm:$0xff]  }
 0x2d2   :  { %v485_v7 = vpack.c.bf16 %v476_v6, %v472_v4  ;;  %v539_v4 = vmul.f32 0.0625, %v537_v62 }
 0x2d3   :  { %v540_v34 = vadd.f32 %v3216_v30, %v3221_v32 }
 0x2d4   :  { %2423 = vmatpush3.bf16.msra.mxu1 %v485_v7 }
 0x2d5   :  { %2463 = vmatprep.subr.mxu1 %v2910_v2  ;;  %v541_v36 = vrot.slane %v540_v34, 4 }
 0x2d7   :  { %2425 = vmatmul.mubr.msk.bf16.vlgmr.msra.gmra.mrb[12].mxu1 %vm340_vm1, %v3125_v43  ;;  %v542_v39 = vadd.f32 %v541_v36, %v540_v34  ;;  %v2746_v34 = vld [vmem:[%s3746_s8 + $0x68] ss:$12 sps:$4 sm:$0xff]  }
 0x2d8   :  { %2465 = vmatprep.mubr.msk.f32.mxu1 %vm2912_vm0, %v2910_v2  ;;  %2464 = vmatpush3.msra.mxu1 %v654_v8  ;;  %v2749_v36 = vld [vmem:[%s3746_s8 + $0x7c] ss:$12 sps:$4 sm:$0xff]  }
 0x2d9   :  { %v543_v42 = vrot.slane %v542_v39, 2  ;;  %943 = vmatprep.subr.bf16.mxu1 %v2729_v14 }
 0x2db   :  { %v544_v51 = vadd.f32 %v543_v42, %v542_v39  ;;  %v2753_v39 = vld [vmem:[%s3746_s8 + $0x94] ss:$12 sps:$4 sm:$0xff]   ;;  %v2757_v42 = vld [vmem:[%s3746_s8 + $0xac] ss:$12 sps:$4 sm:$0xff]  }
 0x2dd   :  { %v545_v55 = vrot.slane %v544_v51, 1 }
 0x2df   :  { %v546_v60 = vadd.f32 %v545_v55, %v544_v51 }
 0x2e1   :  { %v547_v0 = vmul.f32 0.0625, %v546_v60 }
 0x2e3   :  { %v557_v6 = vsel %vm556_vm2, %v539_v4, %v547_v0 }
 0x3aa   :  { %v524_v44 = vpop.f32.mrb[12].mxu1 }
 0x3ab   :  { %v2426_v46 = vpop.f32.mrb[13].mxu1  ;;  %v3233_v48 = vadd.f32 %v524_v44, %v489_v41  ;;  %v2755_v44 = vld [vmem:[%s3746_s8 + $0xa8] ss:$12 sps:$4 sm:$0xff]  }
 0x3ac   :  { %v527_v45 = vpop.f32.mrb[14].mxu1  ;;  %v2758_v46 = vld [vmem:[%s3746_s8 + $0xb0] ss:$12 sps:$4 sm:$0xff]  }
 0x3ad   :  { %v3235_v49 = vadd.f32 %v527_v45, %v489_v41  ;;  %v2427_v50 = vpop.f32.mrb[15].mxu1  ;;  %v2754_v41 = vld [vmem:[%s3746_s8 + $0x98] ss:$12 sps:$4 sm:$0xff]  }
 0x3af   :  { %v548_v52 = vadd.f32 %v3235_v49, %v3233_v48 }
 0x3b1   :  { %v549_v54 = vrot.slane %v548_v52, 4 }
 0x3b3   :  { %v550_v56 = vadd.f32 %v549_v54, %v548_v52 }
 0x3b5   :  { %v551_v59 = vrot.slane %v550_v56, 2 }
 0x3b7   :  { %v552_v61 = vadd.f32 %v551_v59, %v550_v56 }
 0x3b9   :  { %v553_v63 = vrot.slane %v552_v61, 1 }
 0x3bb   :  { %v554_v1 = vadd.f32 %v553_v63, %v552_v61 }
 0x3bd   :  { %v555_v5 = vmul.f32 0.0625, %v554_v1 }
 0x3bf   :  { %v559_v7 = vsel %vm558_vm3, %v557_v6, %v555_v5 }
 0x3c0   :  { %2461 = vmatmul.mubr.f32.vlgmr.msra.gmra.mrb[8].mxu0 %v559_v7 }
 0x3c1   :  { %2484 = vmatprep.mubr.msk.bf16.mxu0 %vm2912_vm0, %v2910_v2  ;;  %2469 = vmatpush3.bf16.msra.mxu0 %v2730_v16 }
 0x3c2   :  { %2470 = vmatprep.subr.bf16.mxu0 %v2910_v2 }
 0x3c5   :  { %2471 = vmatpush3.bf16.msra.mxu0 %v2734_v19 }
 0x3c6   :  { %2472 = vmatprep.subr.bf16.mxu0 %v2910_v2 }
 0x3c9   :  { %2473 = vmatpush3.bf16.msra.mxu0 %v2738_v22 }
 0x3ca   :  { %2474 = vmatprep.subr.bf16.mxu0 %v2910_v2 }
 0x3cd   :  { %2475 = vmatpush3.bf16.msra.mxu0 %v2742_v27 }
 0x3ce   :  { %2476 = vmatprep.subr.bf16.mxu0 %v2910_v2 }
 0x3d1   :  { %2477 = vmatpush3.bf16.msra.mxu0 %v2746_v34 }
 0x3d2   :  { %2478 = vmatprep.subr.bf16.mxu0 %v2910_v2 }
 0x3d5   :  { %2479 = vmatpush3.bf16.msra.mxu0 %v2750_v37 }
 0x3d6   :  { %2480 = vmatprep.subr.bf16.mxu0 %v2910_v2 }
 0x3d9   :  { %2481 = vmatpush3.bf16.msra.mxu0 %v2754_v41 }
 0x3da   :  { %2482 = vmatprep.subr.bf16.mxu0 %v2910_v2 }
 0x3dd   :  { %2483 = vmatpush3.bf16.msra.mxu0 %v2758_v46 }
 0x3de   :  { %2494 = vmatprep.subr.bf16.mxu0 %v2910_v2 }
 0x493   :  { %v649_v10 = vpop.f32.mrb[8].mxu0 }
 0x494   :  { %v650_v11 = vadd.f32 %v2235_v9, %v649_v10  ;;  %v2462_v12 = vpop.f32.mrb[9].mxu0 }
 0x496   :  { %v653_v13 = vmax.f32 %v650_v11, 0.0 }
 0x498   :  { %2466 = vmatmul.mubr.msk.f32.vlgmr.msra.gmra.mrb[16].mxu1 %vm662_vm4, %v653_v13 }
 0x499   :  { %975 = vmatprep.mubr.bf16.mxu1 %v2911_v3  ;;  %944 = vmatpush1.bf16.msra.mxu1 %v2727_v15 }
 0x49a   :  { %945 = vmatprep.subr.bf16.mxu1 %v2733_v17 }
 0x49d   :  { %946 = vmatpush1.bf16.msra.mxu1 %v2731_v18 }
 0x49e   :  { %947 = vmatprep.subr.bf16.mxu1 %v2737_v20 }
 0x4a1   :  { %948 = vmatpush1.bf16.msra.mxu1 %v2735_v21 }
 0x4a2   :  { %949 = vmatprep.subr.bf16.mxu1 %v2741_v23 }
 0x4a5   :  { %950 = vmatpush1.bf16.msra.mxu1 %v2739_v24 }
 0x4a6   :  { %951 = vmatprep.subr.bf16.mxu1 %v2745_v28 }
 0x4a9   :  { %952 = vmatpush1.bf16.msra.mxu1 %v2743_v29 }
 0x4aa   :  { %953 = vmatprep.subr.bf16.mxu1 %v2749_v36 }
 0x4ad   :  { %954 = vmatpush1.bf16.msra.mxu1 %v2747_v35 }
 0x4ae   :  { %955 = vmatprep.subr.bf16.mxu1 %v2753_v39 }
 0x4b1   :  { %956 = vmatpush1.bf16.msra.mxu1 %v2751_v40 }
 0x4b2   :  { %957 = vmatprep.subr.bf16.mxu1 %v2757_v42 }
 0x4b5   :  { %958 = vmatpush1.bf16.msra.mxu1 %v2755_v44 }
 0x56b   :  { %v732_v45 = vpop.f32.mrb[16].mxu1 }
 0x56c   :  { %v733_v50 = vadd.f32 %v2236_v47, %v732_v45  ;;  %v2467_v51 = vpop.f32.mrb[17].mxu1 }
 0x56e   :  { %v737_v52 = vsel %vm736_vm5, %v733_v50, -inf }
 0x56f   :  { %v738_v53 = vrot.slane %v737_v52, 4 }
 0x571   :  { %v739_v54 = vmax.f32 %v737_v52, %v738_v53 }
 0x573   :  { %v740_v55 = vrot.slane %v739_v54, 2 }
 0x575   :  { %v741_v56 = vmax.f32 %v739_v54, %v740_v55 }
 0x577   :  { %v742_v57 = vrot.slane %v741_v56, 1 }
 0x579   :  { %v743_v59 = vmax.f32 %v741_v56, %v742_v57  ;;  %v1250_v57 = vld [vmem:[%s3748_s10] sm:$0xff] }
 0x57b   :  { %v744_v60 = vsub.f32 %v733_v50, %v743_v59  ;;  %v1251_v59 = vld [vmem:[%s3748_s10 + $0x8] sm:$0xff] }
 0x57d   :  { %v745_v61 = vmul.f32 1.442695, %v744_v60  ;;  %v1252_v60 = vld [vmem:[%s3748_s10 + $0x10] sm:$0xff] }
 0x57f   :  { %2803 = vpow2.f32 %v745_v61  ;;  %v2637_v61 = vpack.c.bf16 %v1251_v59, %v1250_v57 }
 0x589   :  { %v2804_v62 = vpop.eup %2803 }
 0x58a   :  { %v747_v63 = vsel %vm736_vm5, %v2804_v62, 0.0 }
 0x58b   :  { %v748_v0 = vrot.slane %v747_v63, 4 }
 0x58d   :  { %v749_v1 = vadd.f32 %v748_v0, %v747_v63  ;;  %v1254_v0 = vld [vmem:[%s3748_s10 + $0x20] sm:$0xff] }
 0x58f   :  { %v750_v4 = vrot.slane %v749_v1, 2 }
 0x591   :  { %v751_v5 = vadd.f32 %v750_v4, %v749_v1  ;;  %v1255_v1 = vld [vmem:[%s3748_s10 + $0x28] sm:$0xff] }
 0x592   :  { %v2643_v4 = vpack.c.bf16 %v1255_v1, %v1254_v0 }
 0x593   :  { %v752_v6 = vrot.slane %v751_v5, 1 }
 0x595   :  { %v753_v7 = vadd.f32 %v752_v6, %v751_v5 }
 0x597   :  { %2805 = vrcp.f32 %v753_v7 }
 0x5a1   :  { %v2806_v8 = vpop.eup %2805 }
 0x5a2   :  { %v755_v9 = vmul.f32 %v2806_v8, %v2804_v62  ;;  %v1253_v62 = vld [vmem:[%s3748_s10 + $0x18] sm:$0xff] }
 0x5a3   :  { %v2640_v63 = vpack.c.bf16 %v1253_v62, %v1252_v60 }
 0x5a4   :  { %v759_v10 = vrot.slane %v755_v9, %v3209_v26  ;;  %v765_v11 = vrot.slane %v755_v9, %v3207_v25  ;;  %v773_v12 = vrot.slane %v755_v9, %v3230_v38 }
 0x5a6   :  { %v760_v13 = vmul.f32 %v759_v10, %v3224_v33  ;;  %v761_v14 = vmul.f32 %v759_v10, %v3219_v31  ;;  %v766_v15 = vmul.f32 %v765_v11, %v3221_v32  ;;  %v767_v16 = vmul.f32 %v765_v11, %v3216_v30  ;;  %v1256_v10 = vld [vmem:[%s3748_s10 + $0x30] sm:$0xff]  ;;  %v1257_v11 = vld [vmem:[%s3748_s10 + $0x38] sm:$0xff] }
 0x5a7   :  { %v774_v19 = vmul.f32 %v773_v12, %v3233_v48  ;;  %v775_v20 = vmul.f32 %v773_v12, %v3235_v49  ;;  %v2646_v12 = vpack.c.bf16 %v1257_v11, %v1256_v10 }
 0x5a8   :  { %v768_v17 = vadd.f32 %v766_v15, %v760_v13  ;;  %v769_v18 = vadd.f32 %v767_v16, %v761_v14  ;;  %v1258_v13 = vld [vmem:[%s3748_s10 + $0x40] sm:$0xff]  ;;  %v1260_v15 = vld [vmem:[%s3748_s10 + $0x50] sm:$0xff]  ;;  %v1261_v16 = vld [vmem:[%s3748_s10 + $0x58] sm:$0xff] }
 0x5aa   :  { %v776_v21 = vadd.f32 %v774_v19, %v768_v17  ;;  %v777_v22 = vadd.f32 %v775_v20, %v769_v18  ;;  %v2652_v17 = vpack.c.bf16 %v1261_v16, %v1260_v15  ;;  %v1262_v18 = vld [vmem:[%s3748_s10 + $0x60] sm:$0xff]  ;;  %v1263_v19 = vld [vmem:[%s3748_s10 + $0x68] sm:$0xff] }
 0x5ab   :  { %v2655_v20 = vpack.c.bf16 %v1263_v19, %v1262_v18  ;;  %v2765_v15 = vld [vmem:[%s3752_s14 + $0x1c] ss:$12 sps:$4 sm:$0xff]   ;;  %v2763_v16 = vld [vmem:[%s3752_s14 + $0x18] ss:$12 sps:$4 sm:$0xff]   ;;  %v2769_v18 = vld [vmem:[%s3752_s14 + $0x34] ss:$12 sps:$4 sm:$0xff]  }
 0x5ac   :  { %v778_v23 = vmax.f32 %v776_v21, 0.0  ;;  %v779_v24 = vmax.f32 %v777_v22, 0.0  ;;  %v1264_v21 = vld [vmem:[%s3748_s10 + $0x70] sm:$0xff]  ;;  %v1265_v22 = vld [vmem:[%s3748_s10 + $0x78] sm:$0xff] }
 0x5ad   :  { %v2767_v19 = vld [vmem:[%s3752_s14 + $0x30] ss:$12 sps:$4 sm:$0xff]  }
 0x5ae   :  { %v782_v27 = vpack.c.bf16 %v779_v24, %v778_v23  ;;  %780 = vst [vmem:[#allocation2] sm:$0xff] %v778_v23  ;;  %781 = vst [vmem:[#allocation2 + $0x8] sm:$0xff] %v779_v24  ;;  %v2658_v23 = vpack.c.bf16 %v1265_v22, %v1264_v21  ;;  %v1033_v24 = vld [vmem:[%s3747_s9] sm:$0x7]  ;;  %v2773_v21 = vld [vmem:[%s3752_s14 + $0x4c] ss:$12 sps:$4 sm:$0xff]  }
 0x5af   :  { %v2771_v22 = vld [vmem:[%s3752_s14 + $0x48] ss:$12 sps:$4 sm:$0xff]  }
 0x5b0   :  { %976 = vmatmul.mubr.bf16.vlgmr.msra.gmra.mrb[20].mxu1 %v782_v27  ;;  %2485 = vmatmul.mubr.bf16.vlgmr.msra.gmra.mrb[12].mxu0 %v782_v27  ;;  %v1175_v27 = vrot.slane %v1033_v24, %v3207_v25 }
 0x5b1   :  { %1069 = vmatprep.mubr.bf16.mxu1 %v2911_v3  ;;  %2496 = vmatprep.mubr.msk.bf16.mxu0 %vm2912_vm0, %v2910_v2 }
 0x683   :  { %v977_v30 = vpop.f32.mrb[20].mxu1  ;;  %v1020_v31 = vpop.f32.mrb[12].mxu0 }
 0x684   :  { %2807 = vtanh.f32 %v977_v30  ;;  %v979_v32 = vpop.f32.mrb[21].mxu1  ;;  %v2486_v33 = vpop.f32.mrb[13].mxu0  ;;  %v1124_v30 = vrot.slane %v1033_v24, %v3209_v26 }
 0x685   :  { %2809 = vtanh.f32 %v1020_v31  ;;  %v981_v48 = vpop.f32.mrb[22].mxu1  ;;  %v1023_v49 = vpop.f32.mrb[14].mxu0 }
 0x686   :  { %2811 = vtanh.f32 %v979_v32  ;;  %v983_v28 = vpop.f32.mrb[23].mxu1  ;;  %v2487_v29 = vpop.f32.mrb[15].mxu0 }
 0x687   :  { %2813 = vtanh.f32 %v981_v48 }
 0x688   :  { %2815 = vtanh.f32 %v1023_v49 }
 0x689   :  { %2817 = vtanh.f32 %v983_v28 }
 0x68e   :  { %v2808_v34 = vpop.eup %2807 }
 0x68f   :  { %v2810_v35 = vpop.eup %2809 }
 0x690   :  { %v2812_v36 = vpop.eup %2811 }
 0x691   :  { %v2814_v37 = vpop.eup %2813 }
 0x692   :  { %v2816_v39 = vpop.eup %2815  ;;  %v1034_v40 = vpack.c.bf16 %v2814_v37, %v2808_v34  ;;  %v1182_v37 = vrot.slane %v1033_v24, %v3230_v38  ;;  %v2777_v24 = vld [vmem:[%s3752_s14 + $0x64] ss:$12 sps:$4 sm:$0xff]  }
 0x693   :  { %v2818_v41 = vpop.eup %2817  ;;  %v1036_v42 = vpack.c.bf16 %v2816_v39, %v2810_v35 }
 0x694   :  { %v1035_v44 = vpack.c.bf16 %v2818_v41, %v2812_v36 }
 0x696   :  { %1037 = vmatprep.subr.bf16.mxu1 %v1035_v44 }
 0x697   :  { %1038 = vmatpush1.bf16.msra.mxu1 %v1034_v40 }
 0x698   :  { %2488 = vmatprep.subr.bf16.mxu1 %v2910_v2 }
 0x69a   :  { %2262 = vmatmul.mubr.msk.bf16.vlgmr.msra.gmra.mrb[24].mxu1 %vm340_vm1, %v3125_v43 }
 0x69b   :  { %2489 = vmatpush3.bf16.msra.mxu1 %v1036_v42  ;;  %2490 = vmatprep.mubr.msk.bf16.mxu1 %vm2912_vm0, %v2910_v2 }
 0x6a2   :  { %2491 = vmatmul.mubr.msk.bf16.vlgmr.msra.gmra.mrb[28].mxu1 %vm340_vm1, %v3125_v43 }
 0x6a3   :  { %1161 = vmatprep.mubr.bf16.mxu1 %v2911_v3 }
 0x76d   :  { %v3356_v46 = vpop.f32.mrb[24].mxu1 }
 0x76e   :  { %v1073_v47 = vpop.f32.mrb[25].mxu1  ;;  %v3437_v48 = vadd.f32 %v1124_v30, %v3356_v46 }
 0x76f   :  { %v3358_v45 = vpop.f32.mrb[26].mxu1 }
 0x770   :  { %v1077_v50 = vpop.f32.mrb[27].mxu1  ;;  %v3432_v32 = vadd.f32 %v1124_v30, %v3358_v45  ;;  %v2778_v30 = vld [vmem:[%s3752_s14 + $0x68] ss:$12 sps:$4 sm:$0xff]  }
 0x771   :  { %v1127_v51 = vpack.c.bf16 %v1077_v50, %v1073_v47 }
 0x772   :  { %v1224_v28 = vadd.f32 %v3432_v32, %v3437_v48 }
 0x774   :  { %v1225_v34 = vrot.slane %v1224_v28, 4 }
 0x775   :  { %v1114_v52 = vpop.f32.mrb[28].mxu1 }
 0x776   :  { %v2492_v53 = vpop.f32.mrb[29].mxu1  ;;  %v1226_v36 = vadd.f32 %v1225_v34, %v1224_v28  ;;  %v2781_v28 = vld [vmem:[%s3752_s14 + $0x7c] ss:$12 sps:$4 sm:$0xff]   ;;  %v2785_v34 = vld [vmem:[%s3752_s14 + $0x94] ss:$12 sps:$4 sm:$0xff]  }
 0x777   :  { %v1117_v54 = vpop.f32.mrb[30].mxu1 }
 0x778   :  { %v1128_v55 = vpack.c.bf16 %v1117_v54, %v1114_v52  ;;  %v2493_v56 = vpop.f32.mrb[31].mxu1  ;;  %v1227_v42 = vrot.slane %v1226_v36, 2 }
 0x77a   :  { %1129 = vmatprep.subr.bf16.mxu1 %v1128_v55  ;;  %v1228_v52 = vadd.f32 %v1227_v42, %v1226_v36  ;;  %v2786_v36 = vld [vmem:[%s3752_s14 + $0x98] ss:$12 sps:$4 sm:$0xff]  }
 0x77b   :  { %1130 = vmatpush1.bf16.msra.mxu1 %v1127_v51 }
 0x77c   :  { %2636 = vmatprep.subr.bf16.mxu1 %v2913_v58  ;;  %v1229_v56 = vrot.slane %v1228_v52, 1 }
 0x77e   :  { %2264 = vmatmul.mubr.msk.bf16.vlgmr.msra.gmra.mrb[32].mxu1 %vm340_vm1, %v3125_v43 }
 0x77f   :  { %2532 = vmatprep.mubr.msk.f32.mxu1 %vm2912_vm0, %v2910_v2  ;;  %2638 = vmatpush3.bf16.msra.mxu1 %v2637_v61  ;;  %v1230_v61 = vadd.f32 %v1229_v56, %v1228_v52 }
 0x780   :  { %2639 = vmatprep.subr.bf16.mxu1 %v2913_v58 }
 0x781   :  { %v1231_v1 = vmul.f32 0.0625, %v1230_v61 }
 0x783   :  { %2641 = vmatpush3.bf16.msra.mxu1 %v2640_v63 }
 0x784   :  { %2642 = vmatprep.subr.bf16.mxu1 %v2913_v58 }
 0x787   :  { %2644 = vmatpush3.bf16.msra.mxu1 %v2643_v4 }
 0x788   :  { %2645 = vmatprep.subr.bf16.mxu1 %v2913_v58 }
 0x78b   :  { %2647 = vmatpush3.bf16.msra.mxu1 %v2646_v12 }
 0x78c   :  { %2648 = vmatprep.subr.bf16.mxu1 %v2913_v58 }
 0x851   :  { %v1163_v5 = vpop.f32.mrb[32].mxu1 }
 0x852   :  { %v1165_v6 = vpop.f32.mrb[33].mxu1  ;;  %v3434_v33 = vadd.f32 %v1175_v27, %v1163_v5 }
 0x853   :  { %v1167_v7 = vpop.f32.mrb[34].mxu1 }
 0x854   :  { %v1169_v8 = vpop.f32.mrb[35].mxu1  ;;  %v3429_v31 = vadd.f32 %v1175_v27, %v1167_v7  ;;  %v1344_v7 = vld [vmem:[%s3750_s12] sm:$0xff]  ;;  %s2914_s12 = smov [#allocation4]  }
 0x855   :  { %v1178_v9 = vpack.c.bf16 %v1169_v8, %v1165_v6  ;;  %v2266_v8 = vld [vmem:[%s3749_s11] ss:$0 sm:$0xff]  ;;  %s2175_s6 = sshll.u32 %s2914_s12, 4  ;;  %s2176_s6 = int_to_ptr.vmem [resolvable:$true] %s2175_s6 }
 0x856   :  { %v1232_v49 = vadd.f32 %v3429_v31, %v3434_v33  ;;  %v2775_v27 = vld [vmem:[%s3752_s14 + $0x60] ss:$12 sps:$4 sm:$0xff]   ;;  %s2840_s11 = scalar_lea.vmem %s2176_s6, 256  ;;  %p2845_p1 = scmp.lt.s32.totalorder %s2176_s6, %s2176_s6 }
 0x857   :  { %2495 = vmatpush3.bf16.msra.mxu0 %v1178_v9  ;;  %p2841_p0 = scmp.ne.s32.totalorder %s2176_s6, %s2840_s11  ;;  %p2846_p2 = scmp.lt.s32.totalorder %s2840_s11, %s2840_s11 }
 0x858   :  { %v1233_v29 = vrot.slane %v1232_v49, 4 }
 0x859   :  { %p2847_p3 = por %p2846_p2, %p2845_p1 }
 0x85a   :  { %2497 = vmatmul.mubr.msk.bf16.vlgmr.msra.gmra.mrb[16].mxu0 %vm340_vm1, %v3125_v43  ;;  %v1259_v43 = vld [vmem:[%s3748_s10 + $0x48] sm:$0xff]  ;;  %v1234_v35 = vadd.f32 %v1233_v29, %v1232_v49  ;;  %v2779_v49 = vld [vmem:[%s3752_s14 + $0x78] ss:$12 sps:$4 sm:$0xff]  }
 0x85b   :  { %1663 = vmatprep.mubr.bf16.mxu0 %v2911_v3  ;;  %v2649_v14 = vpack.c.bf16 %v1259_v43, %v1258_v13  ;;  %v2761_v13 = vld [vmem:[%s3752_s14 + $0x4] ss:$12 sps:$4 sm:$0xff]   ;;  %v2759_v43 = vld [vmem:[%s3752_s14] ss:$12 sps:$4 sm:$0xff]   ;;  %p2848_p4 = pnand %p2847_p3, %p2841_p0 }
 0x85c   :  { %v1235_v39 = vrot.slane %v1234_v35, 2  ;;  %1631 = vmatprep.subr.bf16.mxu0 %v2761_v13  ;;  %v2782_v29 = vld [vmem:[%s3752_s14 + $0x80] ss:$12 sps:$4 sm:$0xff]  }
 0x85d   :  { %2650 = vmatpush3.bf16.msra.mxu1 %v2649_v14  ;;  %v2762_v14 = vld [vmem:[%s3752_s14 + $0x8] ss:$12 sps:$4 sm:$0xff]   ;;  %1632 = vmatpush1.bf16.msra.mxu0 %v2759_v43 }
 0x85e   :  { %2651 = vmatprep.subr.bf16.mxu1 %v2913_v58  ;;  %v1236_v50 = vadd.f32 %v1235_v39, %v1234_v35  ;;  %1633 = vmatprep.subr.bf16.mxu0 %v2765_v15  ;;  %v2783_v35 = vld [vmem:[%s3752_s14 + $0x90] ss:$12 sps:$4 sm:$0xff]   ;;  %v2787_v39 = vld [vmem:[%s3752_s14 + $0xa8] ss:$12 sps:$4 sm:$0xff]  }
 0x860   :  { %v1237_v54 = vrot.slane %v1236_v50, 1 }
 0x861   :  { %2653 = vmatpush3.bf16.msra.mxu1 %v2652_v17  ;;  %v2766_v17 = vld [vmem:[%s3752_s14 + $0x20] ss:$12 sps:$4 sm:$0xff]   ;;  %1634 = vmatpush1.bf16.msra.mxu0 %v2763_v16 }
 0x862   :  { %2654 = vmatprep.subr.bf16.mxu1 %v2913_v58  ;;  %v1238_v59 = vadd.f32 %v1237_v54, %v1236_v50  ;;  %1635 = vmatprep.subr.bf16.mxu0 %v2769_v18 }
 0x864   :  { %v1239_v63 = vmul.f32 0.0625, %v1238_v59 }
 0x865   :  { %2656 = vmatpush3.bf16.msra.mxu1 %v2655_v20  ;;  %v2770_v20 = vld [vmem:[%s3752_s14 + $0x38] ss:$12 sps:$4 sm:$0xff]   ;;  %1636 = vmatpush1.bf16.msra.mxu0 %v2767_v19 }
 0x866   :  { %2657 = vmatprep.subr.bf16.mxu1 %v2913_v58  ;;  %v1248_v5 = vsel %vm556_vm2, %v1231_v1, %v1239_v63  ;;  %1637 = vmatprep.subr.bf16.mxu0 %v2773_v21 }
 0x869   :  { %2659 = vmatpush3.bf16.msra.mxu1 %v2658_v23  ;;  %v2774_v23 = vld [vmem:[%s3752_s14 + $0x50] ss:$12 sps:$4 sm:$0xff]   ;;  %1638 = vmatpush1.bf16.msra.mxu0 %v2771_v22 }
 0x86a   :  { %2535 = vmatprep.subr.mxu1 %v2910_v2  ;;  %1639 = vmatprep.subr.bf16.mxu0 %v2777_v24 }
 0x86d   :  { %1640 = vmatpush1.bf16.msra.mxu0 %v2775_v27 }
 0x86e   :  { %1641 = vmatprep.subr.bf16.mxu0 %v2781_v28 }
 0x871   :  { %1642 = vmatpush1.bf16.msra.mxu0 %v2779_v49 }
 0x872   :  { %1643 = vmatprep.subr.bf16.mxu0 %v2785_v34 }
 0x875   :  { %1644 = vmatpush1.bf16.msra.mxu0 %v2783_v35 }
 0x92d   :  { %v1217_v40 = vpop.f32.mrb[16].mxu0 }
 0x92e   :  { %v2498_v41 = vpop.f32.mrb[17].mxu0  ;;  %v3444_v47 = vadd.f32 %v1217_v40, %v1182_v37  ;;  %v2790_v40 = vld [vmem:[%s3752_s14 + $0xb0] ss:$12 sps:$4 sm:$0xff]  }
 0x92f   :  { %v1220_v44 = vpop.f32.mrb[18].mxu0  ;;  %v2267_v41 = vld [vmem:[%s3751_s13] ss:$0 sm:$0xff] }
 0x930   :  { %v3446_v46 = vadd.f32 %v1220_v44, %v1182_v37  ;;  %v2499_v45 = vpop.f32.mrb[19].mxu0  ;;  %v2789_v37 = vld [vmem:[%s3752_s14 + $0xac] ss:$12 sps:$4 sm:$0xff]  }
 0x931   :  { %1645 = vmatprep.subr.bf16.mxu0 %v2789_v37 }
 0x932   :  { %v1240_v51 = vadd.f32 %v3446_v46, %v3444_v47  ;;  %1646 = vmatpush1.bf16.msra.mxu0 %v2787_v39  ;;  %v2839_v39 = vld [vmem:[%s3773_s25] sm:$0xff]  }
 0x934   :  { %v1241_v53 = vrot.slane %v1240_v51, 4 }
 0x936   :  { %v1242_v55 = vadd.f32 %v1241_v53, %v1240_v51 }
 0x938   :  { %v1243_v57 = vrot.slane %v1242_v55, 2 }
 0x93a   :  { %v1244_v60 = vadd.f32 %v1243_v57, %v1242_v55 }
 0x93c   :  { %v1245_v62 = vrot.slane %v1244_v60, 1 }
 0x93e   :  { %v1246_v0 = vadd.f32 %v1245_v62, %v1244_v60 }
 0x940   :  { %v1247_v4 = vmul.f32 0.0625, %v1246_v0 }
 0x942   :  { %v1249_v6 = vsel %vm558_vm3, %v1248_v5, %v1247_v4 }
 0x943   :  { %2533 = vmatmul.mubr.f32.vlgmr.msra.gmra.mrb[18].mxu1 %v1249_v6 }
 0x944   :  { %2537 = vmatprep.mubr.msk.f32.mxu1 %vm2912_vm0, %v2910_v2  ;;  %2536 = vmatpush3.msra.mxu1 %v1344_v7 }
 0x945   :  { %2540 = vmatprep.subr.bf16.mxu1 %v2910_v2 }
 0xa16   :  { %v1339_v9 = vpop.f32.mrb[18].mxu1 }
 0xa17   :  { %v1340_v10 = vadd.f32 %v2266_v8, %v1339_v9  ;;  %v2534_v11 = vpop.f32.mrb[19].mxu1 }
 0xa19   :  { %v1343_v12 = vmax.f32 %v1340_v10, 0.0 }
 0xa1b   :  { %2538 = vmatmul.mubr.msk.f32.vlgmr.msra.gmra.mrb[36].mxu1 %vm662_vm4, %v1343_v12 }
 0xa1c   :  { %2556 = vmatprep.mubr.msk.bf16.mxu1 %vm2912_vm0, %v2910_v2  ;;  %2541 = vmatpush3.bf16.msra.mxu1 %v2762_v14 }
 0xa1d   :  { %2542 = vmatprep.subr.bf16.mxu1 %v2910_v2 }
 0xa20   :  { %2543 = vmatpush3.bf16.msra.mxu1 %v2766_v17 }
 0xa21   :  { %2544 = vmatprep.subr.bf16.mxu1 %v2910_v2 }
 0xa24   :  { %2545 = vmatpush3.bf16.msra.mxu1 %v2770_v20 }
 0xa25   :  { %2546 = vmatprep.subr.bf16.mxu1 %v2910_v2 }
 0xa28   :  { %2547 = vmatpush3.bf16.msra.mxu1 %v2774_v23 }
 0xa29   :  { %2548 = vmatprep.subr.bf16.mxu1 %v2910_v2 }
 0xa2c   :  { %2549 = vmatpush3.bf16.msra.mxu1 %v2778_v30 }
 0xa2d   :  { %2550 = vmatprep.subr.bf16.mxu1 %v2910_v2 }
 0xa30   :  { %2551 = vmatpush3.bf16.msra.mxu1 %v2782_v29 }
 0xa31   :  { %2552 = vmatprep.subr.bf16.mxu1 %v2910_v2 }
 0xa34   :  { %2553 = vmatpush3.bf16.msra.mxu1 %v2786_v36 }
 0xa35   :  { %2554 = vmatprep.subr.bf16.mxu1 %v2910_v2 }
 0xa38   :  { %2555 = vmatpush3.bf16.msra.mxu1 %v2790_v40 }
 0xa39   :  { %2566 = vmatprep.subr.bf16.mxu1 %v2910_v2 }
 0xaee   :  { %v1421_v42 = vpop.f32.mrb[36].mxu1 }
 0xaef   :  { %v1422_v44 = vadd.f32 %v2267_v41, %v1421_v42  ;;  %v2539_v45 = vpop.f32.mrb[37].mxu1 }
 0xaf1   :  { %v1425_v50 = vsel %vm736_vm5, %v1422_v44, -inf }
 0xaf2   :  { %v1426_v51 = vrot.slane %v1425_v50, 4 }
 0xaf4   :  { %v1427_v52 = vmax.f32 %v1425_v50, %v1426_v51 }
 0xaf6   :  { %v1428_v53 = vrot.slane %v1427_v52, 2 }
 0xaf8   :  { %v1429_v54 = vmax.f32 %v1427_v52, %v1428_v53 }
 0xafa   :  { %v1430_v55 = vrot.slane %v1429_v54, 1 }
 0xafc   :  { %v1431_v56 = vmax.f32 %v1429_v54, %v1430_v55  ;;  %v1939_v55 = vld [vmem:[%s3754_s16 + $0x8] sm:$0xff] }
 0xafe   :  { %v1432_v57 = vsub.f32 %v1422_v44, %v1431_v56  ;;  %v1940_v56 = vld [vmem:[%s3754_s16 + $0x10] sm:$0xff] }
 0xb00   :  { %v1433_v59 = vmul.f32 1.442695, %v1432_v57 }
 0xb02   :  { %2819 = vpow2.f32 %v1433_v59  ;;  %v1941_v59 = vld [vmem:[%s3754_s16 + $0x18] sm:$0xff] }
 0xb0c   :  { %v2820_v60 = vpop.eup %2819 }
 0xb0d   :  { %v1435_v61 = vsel %vm736_vm5, %v2820_v60, 0.0 }
 0xb0e   :  { %v1436_v62 = vrot.slane %v1435_v61, 4 }
 0xb10   :  { %v1437_v63 = vadd.f32 %v1436_v62, %v1435_v61  ;;  %v1942_v61 = vld [vmem:[%s3754_s16 + $0x20] sm:$0xff]  ;;  %v1943_v62 = vld [vmem:[%s3754_s16 + $0x28] sm:$0xff] }
 0xb12   :  { %v1438_v0 = vrot.slane %v1437_v63, 2 }
 0xb14   :  { %v1439_v1 = vadd.f32 %v1438_v0, %v1437_v63  ;;  %v2667_v63 = vpack.c.bf16 %v1943_v62, %v1942_v61 }
 0xb16   :  { %v1440_v4 = vrot.slane %v1439_v1, 1 }
 0xb18   :  { %v1441_v5 = vadd.f32 %v1440_v4, %v1439_v1 }
 0xb1a   :  { %2821 = vrcp.f32 %v1441_v5 }
 0xb24   :  { %v2822_v6 = vpop.eup %2821 }
 0xb25   :  { %v1443_v7 = vmul.f32 %v2822_v6, %v2820_v60  ;;  %v2664_v60 = vpack.c.bf16 %v1941_v59, %v1940_v56 }
 0xb27   :  { %v1447_v8 = vrot.slane %v1443_v7, %v3209_v26  ;;  %v1453_v9 = vrot.slane %v1443_v7, %v3207_v25  ;;  %v1461_v10 = vrot.slane %v1443_v7, %v3230_v38  ;;  %v1944_v7 = vld [vmem:[%s3754_s16 + $0x30] sm:$0xff] }
 0xb29   :  { %v1448_v11 = vmul.f32 %v1447_v8, %v3437_v48  ;;  %v1449_v12 = vmul.f32 %v1447_v8, %v3432_v32  ;;  %v1454_v13 = vmul.f32 %v1453_v9, %v3434_v33  ;;  %v1455_v43 = vmul.f32 %v1453_v9, %v3429_v31  ;;  %v1945_v8 = vld [vmem:[%s3754_s16 + $0x38] sm:$0xff] }
 0xb2a   :  { %v1462_v16 = vmul.f32 %v1461_v10, %v3444_v47  ;;  %v1463_v17 = vmul.f32 %v1461_v10, %v3446_v46  ;;  %v2670_v9 = vpack.c.bf16 %v1945_v8, %v1944_v7  ;;  %v1946_v10 = vld [vmem:[%s3754_s16 + $0x40] sm:$0xff] }
 0xb2b   :  { %v1456_v14 = vadd.f32 %v1454_v13, %v1448_v11  ;;  %v1457_v15 = vadd.f32 %v1455_v43, %v1449_v12  ;;  %v1948_v12 = vld [vmem:[%s3754_s16 + $0x50] sm:$0xff]  ;;  %v1949_v13 = vld [vmem:[%s3754_s16 + $0x58] sm:$0xff] }
 0xb2c   :  { %v2676_v43 = vpack.c.bf16 %v1949_v13, %v1948_v12 }
 0xb2d   :  { %v1464_v18 = vadd.f32 %v1462_v16, %v1456_v14  ;;  %v1465_v19 = vadd.f32 %v1463_v17, %v1457_v15  ;;  %v1950_v14 = vld [vmem:[%s3754_s16 + $0x60] sm:$0xff]  ;;  %v1951_v15 = vld [vmem:[%s3754_s16 + $0x68] sm:$0xff]  ;;  %v1952_v17 = vld [vmem:[%s3754_s16 + $0x70] sm:$0xff] }
 0xb2e   :  { %v2679_v16 = vpack.c.bf16 %v1951_v15, %v1950_v14 }
 0xb2f   :  { %v1466_v20 = vmax.f32 %v1464_v18, 0.0  ;;  %v1467_v21 = vmax.f32 %v1465_v19, 0.0  ;;  %v1953_v18 = vld [vmem:[%s3754_s16 + $0x78] sm:$0xff] }
 0xb30   :  { %v2682_v19 = vpack.c.bf16 %v1953_v18, %v1952_v17 }
 0xb31   :  { %v1470_v22 = vpack.c.bf16 %v1467_v21, %v1466_v20  ;;  %1468 = vst [vmem:[#allocation4] sm:$0xff] %v1466_v20  ;;  %1469 = vst [vmem:[#allocation4 + $0x8] sm:$0xff] %v1467_v21  ;;  %v1721_v20 = vld [vmem:[%s3753_s15] sm:$0x7] }
 0xb32   :  { %v1863_v21 = vrot.slane %v1721_v20, %v3207_v25 }
 0xb33   :  { %1664 = vmatmul.mubr.bf16.vlgmr.msra.gmra.mrb[20].mxu0 %v1470_v22  ;;  %2557 = vmatmul.mubr.bf16.vlgmr.msra.gmra.mrb[40].mxu1 %v1470_v22  ;;  %v1812_v22 = vrot.slane %v1721_v20, %v3209_v26 }
 0xb34   :  { %1757 = vmatprep.mubr.bf16.mxu0 %v2911_v3  ;;  %2568 = vmatprep.mubr.msk.bf16.mxu1 %vm2912_vm0, %v2910_v2 }
 0xc06   :  { %v1665_v31 = vpop.f32.mrb[20].mxu0  ;;  %v1708_v32 = vpop.f32.mrb[40].mxu1 }
 0xc07   :  { %2823 = vtanh.f32 %v1665_v31  ;;  %v1667_v33 = vpop.f32.mrb[21].mxu0  ;;  %v2558_v48 = vpop.f32.mrb[41].mxu1 }
 0xc08   :  { %2825 = vtanh.f32 %v1708_v32  ;;  %v1669_v47 = vpop.f32.mrb[22].mxu0  ;;  %v1711_v46 = vpop.f32.mrb[42].mxu1 }
 0xc09   :  { %2827 = vtanh.f32 %v1667_v33  ;;  %v1671_v23 = vpop.f32.mrb[23].mxu0  ;;  %v2559_v24 = vpop.f32.mrb[43].mxu1 }
 0xc0a   :  { %2829 = vtanh.f32 %v1669_v47 }
 0xc0b   :  { %2831 = vtanh.f32 %v1711_v46 }
 0xc0c   :  { %2833 = vtanh.f32 %v1671_v23 }
 0xc11   :  { %v2824_v27 = vpop.eup %2823 }
 0xc12   :  { %v2826_v30 = vpop.eup %2825 }
 0xc13   :  { %v2828_v49 = vpop.eup %2827 }
 0xc14   :  { %v2830_v28 = vpop.eup %2829 }
 0xc15   :  { %v2832_v29 = vpop.eup %2831  ;;  %v1722_v34 = vpack.c.bf16 %v2830_v28, %v2824_v27 }
 0xc16   :  { %v2834_v35 = vpop.eup %2833  ;;  %v1724_v36 = vpack.c.bf16 %v2832_v29, %v2826_v30  ;;  %v1870_v30 = vrot.slane %v1721_v20, %v3230_v38 }
 0xc17   :  { %v1723_v37 = vpack.c.bf16 %v2834_v35, %v2828_v49 }
 0xc19   :  { %1725 = vmatprep.subr.bf16.mxu0 %v1723_v37 }
 0xc1a   :  { %1726 = vmatpush1.bf16.msra.mxu0 %v1722_v34 }
 0xc1b   :  { %2560 = vmatprep.subr.bf16.mxu0 %v2910_v2 }
 0xc1d   :  { %2293 = vmatmul.mubr.msk.bf16.vlgmr.msra.gmra.mrb[24].mxu0 %vm340_vm1, %v2839_v39 }
 0xc1e   :  { %2561 = vmatpush3.bf16.msra.mxu0 %v1724_v36  ;;  %2562 = vmatprep.mubr.msk.bf16.mxu0 %vm2912_vm0, %v2910_v2 }
 0xc25   :  { %2563 = vmatmul.mubr.msk.bf16.vlgmr.msra.gmra.mrb[28].mxu0 %vm340_vm1, %v2839_v39 }
 0xc26   :  { %1849 = vmatprep.mubr.bf16.mxu0 %v2911_v3  ;;  %v1938_v3 = vld [vmem:[%s3754_s16] sm:$0xff] }
 0xc27   :  { %v2661_v57 = vpack.c.bf16 %v1939_v55, %v1938_v3 }
 0xcf0   :  { %v3570_v40 = vpop.f32.mrb[24].mxu0 }
 0xcf1   :  { %v1761_v41 = vpop.f32.mrb[25].mxu0  ;;  %v3650_v48 = vadd.f32 %v1812_v22, %v3570_v40 }
 0xcf2   :  { %v3572_v42 = vpop.f32.mrb[26].mxu0 }
 0xcf3   :  { %v1765_v44 = vpop.f32.mrb[27].mxu0  ;;  %v3645_v32 = vadd.f32 %v1812_v22, %v3572_v42 }
 0xcf4   :  { %v1815_v45 = vpack.c.bf16 %v1765_v44, %v1761_v41 }
 0xcf5   :  { %v1912_v47 = vadd.f32 %v3645_v32, %v3650_v48 }
 0xcf7   :  { %v1913_v23 = vrot.slane %v1912_v47, 4 }
 0xcf8   :  { %v1802_v50 = vpop.f32.mrb[28].mxu0 }
 0xcf9   :  { %v2564_v51 = vpop.f32.mrb[29].mxu0  ;;  %v1914_v27 = vadd.f32 %v1913_v23, %v1912_v47 }
 0xcfa   :  { %v1805_v52 = vpop.f32.mrb[30].mxu0 }
 0xcfb   :  { %v1816_v53 = vpack.c.bf16 %v1805_v52, %v1802_v50  ;;  %v2565_v54 = vpop.f32.mrb[31].mxu0  ;;  %v1915_v34 = vrot.slane %v1914_v27, 2 }
 0xcfd   :  { %1817 = vmatprep.subr.bf16.mxu0 %v1816_v53  ;;  %v1916_v42 = vadd.f32 %v1915_v34, %v1914_v27 }
 0xcfe   :  { %1818 = vmatpush1.bf16.msra.mxu0 %v1815_v45 }
 0xcff   :  { %2660 = vmatprep.subr.bf16.mxu0 %v2913_v58  ;;  %v1917_v51 = vrot.slane %v1916_v42, 1 }
 0xd01   :  { %2295 = vmatmul.mubr.msk.bf16.vlgmr.msra.gmra.mrb[32].mxu0 %vm340_vm1, %v2839_v39  ;;  %v1918_v3 = vadd.f32 %v1917_v51, %v1916_v42 }
 0xd02   :  { %2604 = vmatprep.mubr.msk.f32.mxu0 %vm2912_vm0, %v2910_v2  ;;  %2662 = vmatpush3.bf16.msra.mxu0 %v2661_v57 }
 0xd03   :  { %2663 = vmatprep.subr.bf16.mxu0 %v2913_v58  ;;  %v1919_v59 = vmul.f32 0.0625, %v1918_v3 }
 0xd06   :  { %2665 = vmatpush3.bf16.msra.mxu0 %v2664_v60 }
 0xd07   :  { %2666 = vmatprep.subr.bf16.mxu0 %v2913_v58 }
 0xd0a   :  { %2668 = vmatpush3.bf16.msra.mxu0 %v2667_v63  ;;  %v2032_v63 = vld [vmem:[%s3756_s18] sm:$0xff] }
 0xd0b   :  { %2669 = vmatprep.subr.bf16.mxu0 %v2913_v58 }
 0xd0e   :  { %2671 = vmatpush3.bf16.msra.mxu0 %v2670_v9 }
 0xd0f   :  { %2672 = vmatprep.subr.bf16.mxu0 %v2913_v58 }
 0xdd4   :  { %v1851_v0 = vpop.f32.mrb[32].mxu0 }
 0xdd5   :  { %v1853_v1 = vpop.f32.mrb[33].mxu0  ;;  %v3647_v33 = vadd.f32 %v1863_v21, %v1851_v0  ;;  %v2297_v0 = vld [vmem:[%s3755_s17] ss:$0 sm:$0xff] }
 0xdd6   :  { %v1855_v4 = vpop.f32.mrb[34].mxu0 }
 0xdd7   :  { %v1857_v5 = vpop.f32.mrb[35].mxu0  ;;  %v3642_v31 = vadd.f32 %v1863_v21, %v1855_v4 }
 0xdd8   :  { %v1866_v6 = vpack.c.bf16 %v1857_v5, %v1853_v1 }
 0xdda   :  { %2567 = vmatpush3.bf16.msra.mxu1 %v1866_v6 }
 0xddb   :  { %2607 = vmatprep.subr.mxu1 %v2910_v2 }
 0xddd   :  { %2569 = vmatmul.mubr.msk.bf16.vlgmr.msra.gmra.mrb[44].mxu1 %vm340_vm1, %v2839_v39 }
 0xdde   :  { %2609 = vmatprep.mubr.msk.f32.mxu1 %vm2912_vm0, %v2910_v2  ;;  %v1947_v2 = vld [vmem:[%s3754_s16 + $0x48] sm:$0xff]  ;;  %2608 = vmatpush3.msra.mxu1 %v2032_v63 }
 0xddf   :  { %v2673_v11 = vpack.c.bf16 %v1947_v2, %v1946_v10 }
 0xde1   :  { %2674 = vmatpush3.bf16.msra.mxu0 %v2673_v11 }
 0xde2   :  { %2675 = vmatprep.subr.bf16.mxu0 %v2913_v58 }
 0xde5   :  { %2677 = vmatpush3.bf16.msra.mxu0 %v2676_v43 }
 0xde6   :  { %2678 = vmatprep.subr.bf16.mxu0 %v2913_v58 }
 0xde9   :  { %2680 = vmatpush3.bf16.msra.mxu0 %v2679_v16 }
 0xdea   :  { %2681 = vmatprep.subr.bf16.mxu0 %v2913_v58  ;;  %v1920_v58 = vadd.f32 %v3642_v31, %v3647_v33 }
 0xdec   :  { %v1921_v46 = vrot.slane %v1920_v58, 4 }
 0xded   :  { %2683 = vmatpush3.bf16.msra.mxu0 %v2682_v19 }
 0xdee   :  { %v1922_v24 = vadd.f32 %v1921_v46, %v1920_v58 }
 0xdf0   :  { %v1923_v49 = vrot.slane %v1922_v24, 2 }
 0xdf2   :  { %v1924_v40 = vadd.f32 %v1923_v49, %v1922_v24 }
 0xdf4   :  { %v1925_v45 = vrot.slane %v1924_v40, 1 }
 0xdf6   :  { %v1926_v53 = vadd.f32 %v1925_v45, %v1924_v40 }
 0xdf8   :  { %v1927_v56 = vmul.f32 0.0625, %v1926_v53 }
 0xdfa   :  { %v1936_v61 = vsel %vm556_vm2, %v1919_v59, %v1927_v56 }
 0xeb0   :  { %v1905_v28 = vpop.f32.mrb[44].mxu1 }
 0xeb1   :  { %v2570_v29 = vpop.f32.mrb[45].mxu1  ;;  %v3657_v36 = vadd.f32 %v1905_v28, %v1870_v30 }
 0xeb2   :  { %v1908_v35 = vpop.f32.mrb[46].mxu1 }
 0xeb3   :  { %v3659_v37 = vadd.f32 %v1908_v35, %v1870_v30  ;;  %v2571_v39 = vpop.f32.mrb[47].mxu1 }
 0xeb5   :  { %v1928_v41 = vadd.f32 %v3659_v37, %v3657_v36 }
 0xeb7   :  { %v1929_v44 = vrot.slane %v1928_v41, 4 }
 0xeb9   :  { %v1930_v50 = vadd.f32 %v1929_v44, %v1928_v41 }
 0xebb   :  { %v1931_v52 = vrot.slane %v1930_v50, 2 }
 0xebd   :  { %v1932_v54 = vadd.f32 %v1931_v52, %v1930_v50 }
 0xebf   :  { %v1933_v55 = vrot.slane %v1932_v54, 1 }
 0xec1   :  { %v1934_v57 = vadd.f32 %v1933_v55, %v1932_v54 }
 0xec3   :  { %v1935_v60 = vmul.f32 0.0625, %v1934_v57 }
 0xec5   :  { %v1937_v62 = vsel %vm558_vm3, %v1936_v61, %v1935_v60 }
 0xec6   :  { %2605 = vmatmul.mubr.f32.vlgmr.msra.gmra.mrb[10].mxu0 %v1937_v62 }
 0xf99   :  { %v2027_v1 = vpop.f32.mrb[10].mxu0 }
 0xf9a   :  { %v2028_v4 = vadd.f32 %v2297_v0, %v2027_v1  ;;  %v2606_v5 = vpop.f32.mrb[11].mxu0 }
 0xf9c   :  { %v2031_v6 = vmax.f32 %v2028_v4, 0.0 }
 0xf9e   :  { %2610 = vmatmul.mubr.msk.f32.vlgmr.msra.gmra.mrb[38].mxu1 %vm662_vm4, %v2031_v6 }
 0xf9f   :  { %2851 = shalt.err (!%p2848_p4)
}
 0xfa0   :  { %s2852_s3 = scalar_lea.hbm %s3759_s21, 256 }
 0xfa1   :  { %p2853_p5 = scmp.ne.s32.totalorder %s3759_s21, %s2852_s3  ;;  %p2856_p6 = scmp.lt.u32.totalorder %s2852_s3, %s3759_s21 }
 0xfa3   :  { %p2858_p7 = pnand %p2856_p6, %p2853_p5 }
 0xfa5   :  { %2861 = shalt.err (!%p2858_p7)
}
 0xfa6   :  { %s2916_s25 = smov 128   ;;  %s2917_s4 = smov 8  }
 0xfa7   :  { %2181 = dma.vmem_to_hbm [thread:$0]  %s2176_s6, 256, %s3759_s21, [#allocation5], %s2916_s25, %s2916_s25, %s2917_s4  }
 0xfa8   :  { %s2862_s1 = scalar_lea.vmem %s3672_s2, 256  ;;  %p2867_p9 = scmp.lt.s32.totalorder %s3672_s2, %s3672_s2 }
 0xfa9   :  { %p2863_p8 = scmp.ne.s32.totalorder %s3672_s2, %s2862_s1  ;;  %p2868_p10 = scmp.lt.s32.totalorder %s2862_s1, %s2862_s1 }
 0xfab   :  { %p2869_p11 = por %p2868_p10, %p2867_p9 }
 0xfad   :  { %p2870_p12 = pnand %p2869_p11, %p2863_p8 }
 0xfaf   :  { %2873 = shalt.err (!%p2870_p12)
}
 0xfb0   :  { %s2874_s9 = scalar_lea.hbm %s3758_s20, 256 }
 0xfb1   :  { %p2875_p13 = scmp.ne.s32.totalorder %s3758_s20, %s2874_s9  ;;  %p2878_p0 = scmp.lt.u32.totalorder %s2874_s9, %s3758_s20 }
 0xfb3   :  { %p2880_p1 = pnand %p2878_p0, %p2875_p13 }
 0xfb5   :  { %2883 = shalt.err (!%p2880_p1)
}
 0xfb6   :  { %2169 = dma.vmem_to_hbm [thread:$0]  %s3672_s2, 256, %s3758_s20, [#allocation3], %s2916_s25, %s2916_s25, %s2917_s4  }
 0xfb7   :  { %v2298_v7 = vld [vmem:[%s3757_s19] ss:$0 sm:$0xff]  ;;  %s2918_s19 = smov [#allocation6]  }
 0xfb8   :  { %s2187_s20 = sshll.u32 %s2918_s19, 4  ;;  %s2188_s20 = int_to_ptr.vmem [resolvable:$true] %s2187_s20 }
 0xfb9   :  { %s2884_s12 = scalar_lea.vmem %s2188_s20, 256  ;;  %p2889_p3 = scmp.lt.s32.totalorder %s2188_s20, %s2188_s20 }
 0xfba   :  { %p2885_p2 = scmp.ne.s32.totalorder %s2188_s20, %s2884_s12  ;;  %p2890_p4 = scmp.lt.s32.totalorder %s2884_s12, %s2884_s12 }
 0xfbc   :  { %p2891_p5 = por %p2890_p4, %p2889_p3 }
 0xfbe   :  { %p2892_p6 = pnand %p2891_p5, %p2885_p2 }
0x1071   :  { %v2109_v8 = vpop.f32.mrb[38].mxu1 }
0x1072   :  { %v2110_v9 = vadd.f32 %v2298_v7, %v2109_v8  ;;  %v2611_v10 = vpop.f32.mrb[39].mxu1 }
0x1074   :  { %v2113_v2 = vsel %vm736_vm5, %v2110_v9, -inf }
0x1075   :  { %v2114_v11 = vrot.slane %v2113_v2, 4 }
0x1077   :  { %v2115_v12 = vmax.f32 %v2113_v2, %v2114_v11 }
0x1079   :  { %v2116_v13 = vrot.slane %v2115_v12, 2 }
0x107b   :  { %v2117_v43 = vmax.f32 %v2115_v12, %v2116_v13 }
0x107d   :  { %v2118_v14 = vrot.slane %v2117_v43, 1 }
0x107f   :  { %v2119_v15 = vmax.f32 %v2117_v43, %v2118_v14 }
0x1081   :  { %v2120_v16 = vsub.f32 %v2110_v9, %v2119_v15 }
0x1083   :  { %v2121_v17 = vmul.f32 1.442695, %v2120_v16 }
0x1085   :  { %2835 = vpow2.f32 %v2121_v17 }
0x108f   :  { %v2836_v18 = vpop.eup %2835 }
0x1090   :  { %v2123_v19 = vsel %vm736_vm5, %v2836_v18, 0.0 }
0x1091   :  { %v2124_v20 = vrot.slane %v2123_v19, 4 }
0x1093   :  { %v2125_v21 = vadd.f32 %v2124_v20, %v2123_v19 }
0x1095   :  { %v2126_v22 = vrot.slane %v2125_v21, 2 }
0x1097   :  { %v2127_v58 = vadd.f32 %v2126_v22, %v2125_v21 }
0x1099   :  { %v2128_v47 = vrot.slane %v2127_v58, 1 }
0x109b   :  { %v2129_v46 = vadd.f32 %v2128_v47, %v2127_v58 }
0x109d   :  { %2837 = vrcp.f32 %v2129_v46 }
0x10a7   :  { %v2838_v23 = vpop.eup %2837 }
0x10a8   :  { %v2131_v24 = vmul.f32 %v2838_v23, %v2836_v18 }
0x10aa   :  { %v2135_v27 = vrot.slane %v2131_v24, %v3209_v26  ;;  %v2141_v30 = vrot.slane %v2131_v24, %v3207_v25  ;;  %v2149_v49 = vrot.slane %v2131_v24, %v3230_v38 }
0x10ac   :  { %v2136_v28 = vmul.f32 %v2135_v27, %v3650_v48  ;;  %v2137_v29 = vmul.f32 %v2135_v27, %v3645_v32  ;;  %v2142_v34 = vmul.f32 %v2141_v30, %v3647_v33  ;;  %v2143_v35 = vmul.f32 %v2141_v30, %v3642_v31 }
0x10ad   :  { %v2150_v41 = vmul.f32 %v2149_v49, %v3657_v36  ;;  %v2151_v42 = vmul.f32 %v2149_v49, %v3659_v37 }
0x10ae   :  { %v2144_v39 = vadd.f32 %v2142_v34, %v2136_v28  ;;  %v2145_v40 = vadd.f32 %v2143_v35, %v2137_v29 }
0x10b0   :  { %v2152_v26 = vadd.f32 %v2150_v41, %v2144_v39  ;;  %v2153_v25 = vadd.f32 %v2151_v42, %v2145_v40 }
0x10b2   :  { %v2154_v44 = vmax.f32 %v2152_v26, 0.0  ;;  %v2155_v38 = vmax.f32 %v2153_v25, 0.0 }
0x10b4   :  { %2156 = vst [vmem:[#allocation6] sm:$0xff] %v2154_v44  ;;  %2157 = vst [vmem:[#allocation6 + $0x8] sm:$0xff] %v2155_v38 }
0x10b5   :  { %2895 = shalt.err (!%p2892_p6)
}
0x10b6   :  { %s2896_s2 = scalar_lea.hbm %s3760_s22, 256 }
0x10b7   :  { %p2897_p7 = scmp.ne.s32.totalorder %s3760_s22, %s2896_s2  ;;  %p2900_p8 = scmp.lt.u32.totalorder %s2896_s2, %s3760_s22 }
0x10b9   :  { %p2902_p9 = pnand %p2900_p8, %p2897_p7 }
0x10bb   :  { %2905 = shalt.err (!%p2902_p9)
}
0x10bc   :  { %2193 = dma.vmem_to_hbm [thread:$0]  %s2188_s20, 256, %s3760_s22, [#allocation5], %s2916_s25, %s2916_s25, %s2917_s4  }
0x10bd   :  { %2906 = dma.done.wait [#allocation3], 256  }
0x10be   :  { %2907 = vsyncadd [#allocation3], 4294967040 }
0x10bf   :  { %2908 = dma.done.wait [#allocation5], 512  }
0x10c0   :  { %2909 = vsyncadd [#allocation5], 4294966784 }
0x10c1   :  { %2203 = vsyncpa [#allocation3], 1 }
0x10c2   :  { %2204 = vsyncpa [#allocation5], 1 }

</bundles_post_ra>
